<compile_context>
chip_gen: v6e
topology: v6e:2x2x1
jax: 0.10.0
libtpu: 0.0.40
codegen_flags: <defaults>
</compile_context>

<pallas_src>
import math

import jax
import jax.numpy as jnp
from jax.experimental import pallas as pl
from jax.experimental.pallas import tpu as pltpu


# ---------------------------------------------------------------------------
# Fused kernel: num_layers GRU layers + LayerNorm -> Tanh -> Linear(H, 2).
# ---------------------------------------------------------------------------
def _make_fused_kernel(num_layers, T, B, H):
    H2, H3 = 2 * H, 3 * H

    def kernel(*refs):
        x_ref, h0_ref, w_ih0_ref, w_hh0_ref, b0_ref = refs[:5]
        upper_refs = refs[5:5 + 2 * (num_layers - 1)]
        (ln_g_ref, ln_b_ref, w_out_ref, b_out_ref,
         o_ref) = refs[5 + 2 * (num_layers - 1):]

        # --- Load weights/biases once (tiny; they live in vregs). -----------
        w_hh0 = w_hh0_ref[...]                              # (H, 3H) bf16
        b0 = b0_ref[...]                                    # (1, 4H) f32
        b_hn0 = b0[:, H3:]                                  # (1, H)
        w_cat = [upper_refs[2 * i][...] for i in range(num_layers - 1)]
        b_up = [upper_refs[2 * i + 1][...] for i in range(num_layers - 1)]

        # --- Hoisted layer-0 input projection: one bf16 MXU push, off the
        #     serial recurrence chain.  Bias already folded (r,z: b_ih+b_hh;
        #     n: b_ih only).
        gi0 = jnp.dot(x_ref[...].astype(jnp.bfloat16), w_ih0_ref[...],
                      preferred_element_type=jnp.float32) + b0[:, :H3]  # (T*B,3H)

        # Per-layer hidden state; all elementwise math in f32.
        h = [h0_ref[l].astype(jnp.float32) for l in range(num_layers)]

        def step_layer0(t):
            # Single bf16 MXU push on the chain: (B, H) @ (H, 3H).
            gh = jnp.dot(h[0].astype(jnp.bfloat16), w_hh0,
                         preferred_element_type=jnp.float32)
            gi_t = gi0[t * B:(t + 1) * B, :]
            rz = jax.nn.sigmoid(gi_t[:, :H2] + gh[:, :H2])  # one EUP issue (r|z)
            r, z = rz[:, :H], rz[:, H:]
            n = jnp.tanh(gi_t[:, H2:] + r * (gh[:, H2:] + b_hn0))
            h[0] = (1.0 - z) * n + z * h[0]

        def step_upper(l, t):
            # Single bf16 MXU push fusing input+hidden projections:
            # (B, 2H) @ (2H, 4H) with column blocks [r|z , n_x , n_h] so that
            # n = tanh(n_x + r * n_h) keeps PyTorch GRU semantics exactly.
            xin = jnp.concatenate([h[l - 1], h[l]], axis=1).astype(jnp.bfloat16)
            g = jnp.dot(xin, w_cat[l - 1],
                        preferred_element_type=jnp.float32) + b_up[l - 1]
            rz = jax.nn.sigmoid(g[:, :H2])                  # one EUP issue (r|z)
            r, z = rz[:, :H], rz[:, H:]
            n = jnp.tanh(g[:, H2:H3] + r * g[:, H3:])
            h[l] = (1.0 - z) * n + z * h[l]

        # Wavefront (diagonal) schedule: layer l step t runs one diagonal after
        # layer l-1 step t.  Within a diagonal, higher layers go first so they
        # consume the lower layer's previous-step output before it is updated.
        # Fully unrolled (T, num_layers small & static) -> one basic block,
        # static addresses, full scheduler visibility.
        for d in range(T + num_layers - 1):
            for l in range(num_layers - 1, -1, -1):
                t = d - l
                if 0 <= t < T:
                    if l == 0:
                        step_layer0(t)
                    else:
                        step_upper(l, t)

        # Head on the last layer's final hidden state (== out_x[-1]):
        # LayerNorm(eps=1e-5) -> Tanh -> Linear(H, 2).  Kept fully in f32.
        hl = h[num_layers - 1]
        mean = jnp.mean(hl, axis=-1, keepdims=True)
        var = jnp.mean(jnp.square(hl - mean), axis=-1, keepdims=True)
        xhat = (hl - mean) * jax.lax.rsqrt(var + 1e-5)
        y = jnp.tanh(xhat * ln_g_ref[...] + ln_b_ref[...])
        o = jnp.dot(y, w_out_ref[...],
                    preferred_element_type=jnp.float32) + b_out_ref[...]
        o_ref[...] = o.astype(o_ref.dtype)

    return kernel


# ---------------------------------------------------------------------------
# Raw parameters (deterministic, PyTorch-style uniform(-1/sqrt(H), 1/sqrt(H))).
# Stored pre-transposed: w_ih (in, 3H), w_hh (H, 3H), biases (1, 3H), gate
# order [r, z, n] (PyTorch GRU convention).
# ---------------------------------------------------------------------------
def init_params(key, feature_size, hidden_size, num_layers):
    H = hidden_size
    k = 1.0 / math.sqrt(H)
    gru = []
    for layer in range(num_layers):
        in_sz = feature_size if layer == 0 else H
        key, k1, k2, k3, k4 = jax.random.split(key, 5)
        w_ih = jax.random.uniform(k1, (in_sz, 3 * H), jnp.float32, -k, k)
        w_hh = jax.random.uniform(k2, (H, 3 * H), jnp.float32, -k, k)
        b_ih = jax.random.uniform(k3, (1, 3 * H), jnp.float32, -k, k)
        b_hh = jax.random.uniform(k4, (1, 3 * H), jnp.float32, -k, k)
        gru.append((w_ih, w_hh, b_ih, b_hh))
    key, k5, k6 = jax.random.split(key, 3)
    return {
        "gru": gru,
        "ln_g": jnp.ones((1, H), jnp.float32),
        "ln_b": jnp.zeros((1, H), jnp.float32),
        "w_out": jax.random.uniform(k5, (H, 2), jnp.float32, -k, k),
        "b_out": jax.random.uniform(k6, (1, 2), jnp.float32, -k, k),
    }


# ---------------------------------------------------------------------------
# One-time re-layout of raw params into kernel-ready form (done outside the
# per-call forward path; in a real setup this is done once at model load).
# ---------------------------------------------------------------------------
def prepare_params(params):
    H = params["ln_g"].shape[-1]
    H2 = 2 * H

    def fold_bias(b_ih, b_hh):
        # (1, 4H) f32: [ (b_ir+b_hr | b_iz+b_hz) , b_in , b_hn ]
        return jnp.concatenate(
            [b_ih[:, :H2] + b_hh[:, :H2], b_ih[:, H2:], b_hh[:, H2:]], axis=1)

    w_ih0, w_hh0, b_ih0, b_hh0 = params["gru"][0]
    prepared = {
        "w_ih0": w_ih0.astype(jnp.bfloat16),        # (F, 3H) bf16
        "w_hh0": w_hh0.astype(jnp.bfloat16),        # (H, 3H) bf16
        "b0": fold_bias(b_ih0, b_hh0),              # (1, 4H) f32
        "upper": [],
        "ln_g": params["ln_g"], "ln_b": params["ln_b"],
        "w_out": params["w_out"], "b_out": params["b_out"],
    }
    zeros = jnp.zeros((H, H), jnp.float32)
    for (w_ih, w_hh, b_ih, b_hh) in params["gru"][1:]:
        # (2H, 4H): rows [x ; h]; cols [r|z (x+h) , n (x only) , n (h only)].
        w_cat = jnp.concatenate([
            jnp.concatenate([w_ih[:, :H2], w_ih[:, H2:], zeros], axis=1),
            jnp.concatenate([w_hh[:, :H2], zeros, w_hh[:, H2:]], axis=1),
        ], axis=0).astype(jnp.bfloat16)
        prepared["upper"].append((w_cat, fold_bias(b_ih, b_hh)))
    return prepared


# ---------------------------------------------------------------------------
# Forward (mirrors MyGRU.forward) — a single fused pallas_call.
# ---------------------------------------------------------------------------
def my_gru_forward(x, kparams, h0_all):
    B, T, F = x.shape
    H = kparams["ln_g"].shape[-1]
    num_layers = 1 + len(kparams["upper"])

    # PyTorch: x.view(T, B, -1) is a pure row-major reshape; flattening
    # (B, T, F) to (T*B, F) reproduces it (no-copy), and x_flat[t*B:(t+1)*B]
    # is timestep t's batch.
    x_flat = jnp.reshape(x, (T * B, F)).astype(jnp.float32)

    # TODO(synk): nn.GRU inter-layer dropout(p=0.2) is training-only; this
    # implements inference semantics (dropout = identity).
    inputs = [x_flat, h0_all.astype(jnp.float32),
              kparams["w_ih0"], kparams["w_hh0"], kparams["b0"]]
    for (w_cat, b) in kparams["upper"]:
        inputs += [w_cat, b]
    inputs += [kparams["ln_g"], kparams["ln_b"],
               kparams["w_out"], kparams["b_out"]]

    # Everything (a few KB) lives in VMEM; no grid, no scratch, only the
    # final (B, 2) result leaves the kernel.
    kernel = _make_fused_kernel(num_layers, T, B, H)
    return pl.pallas_call(
        kernel,
        out_shape=jax.ShapeDtypeStruct((B, 2), jnp.float32),
        in_specs=[pl.BlockSpec(memory_space=pltpu.MemorySpace.VMEM)] * len(inputs),
        out_specs=pl.BlockSpec(memory_space=pltpu.MemorySpace.VMEM),
    )(*inputs)


# ---------------------------------------------------------------------------
# Pure-JAX reference.  matmul_dtype=bf16 mirrors the kernel's "bf16 operands,
# f32 accumulation" MXU policy; matmul_dtype=f32 is the exact-math baseline.
# ---------------------------------------------------------------------------
def reference_forward(x, params, h0_all, matmul_dtype=jnp.float32):
    B, T, F = x.shape
    xs = jnp.reshape(x, (T, B, F)).astype(jnp.float32)
    h_seq = xs
    for layer, (w_ih, w_hh, b_ih, b_hh) in enumerate(params["gru"]):
        H = w_hh.shape[0]
        w_ih_c = w_ih.astype(matmul_dtype)
        w_hh_c = w_hh.astype(matmul_dtype)

        def step(h, xt, w_ih=w_ih_c, w_hh=w_hh_c, b_ih=b_ih, b_hh=b_hh, H=H):
            gi = jnp.dot(xt.astype(matmul_dtype), w_ih,
                         preferred_element_type=jnp.float32) + b_ih
            gh = jnp.dot(h.astype(matmul_dtype), w_hh,
                         preferred_element_type=jnp.float32) + b_hh
            r = jax.nn.sigmoid(gi[:, :H] + gh[:, :H])
            z = jax.nn.sigmoid(gi[:, H:2 * H] + gh[:, H:2 * H])
            n = jnp.tanh(gi[:, 2 * H:] + r * gh[:, 2 * H:])
            h_new = (1.0 - z) * n + z * h
            return h_new, h_new

        _, h_seq = jax.lax.scan(step, h0_all[layer].astype(jnp.float32), h_seq)
    h_last = h_seq[-1]
    mean = jnp.mean(h_last, -1, keepdims=True)
    var = jnp.mean((h_last - mean) ** 2, -1, keepdims=True)
    y = jnp.tanh((h_last - mean) / jnp.sqrt(var + 1e-5)
                 * params["ln_g"] + params["ln_b"])
    return y @ params["w_out"] + params["b_out"]


if __name__ == "__main__":
    feature_size, hidden_size, num_layers = 16, 32, 2
    B, T = 2, 8

    key = jax.random.PRNGKey(0)
    kx, kh, kp = jax.random.split(key, 3)
    x = jax.random.normal(kx, (B, T, feature_size), jnp.float32)
    # Deterministic stand-in for torch.randn(num_layers, batch, hidden).cuda()
    h0_all = jax.random.normal(kh, (num_layers, B, hidden_size), jnp.float32)
    params = init_params(kp, feature_size, hidden_size, num_layers)

    # One-time weight re-layout / bias folding / bf16 cast (off the forward).
    kparams = prepare_params(params)

    out = jax.block_until_ready(my_gru_forward(x, kparams, h0_all))
    assert out.shape == (B, 2), out.shape

    # Structural check vs. a reference using the same bf16-operand MXU policy.
    ref_bf16 = reference_forward(x, params, h0_all, matmul_dtype=jnp.bfloat16)
    assert jnp.allclose(out, ref_bf16, atol=1e-2, rtol=1e-2), (out, ref_bf16)
    # Sanity check vs. the full-f32 reference (looser: bf16 MXU operands).
    ref_f32 = reference_forward(x, params, h0_all, matmul_dtype=jnp.float32)
    assert jnp.allclose(out, ref_f32, atol=5e-2, rtol=5e-2), (out, ref_f32)
    print("KERNEL_OK")
</pallas_src>

<mosaic_0001>
module attributes {stable_mosaic.version = 11 : i64} {
  func.func @kernel(%arg0: memref<16x16xf32, #tpu.memory_space<vmem>>, %arg1: memref<2x2x32xf32, #tpu.memory_space<vmem>>, %arg2: memref<16x96xbf16, #tpu.memory_space<vmem>>, %arg3: memref<32x96xbf16, #tpu.memory_space<vmem>>, %arg4: memref<1x128xf32, #tpu.memory_space<vmem>>, %arg5: memref<64x128xbf16, #tpu.memory_space<vmem>>, %arg6: memref<1x128xf32, #tpu.memory_space<vmem>>, %arg7: memref<1x32xf32, #tpu.memory_space<vmem>>, %arg8: memref<1x32xf32, #tpu.memory_space<vmem>>, %arg9: memref<32x2xf32, #tpu.memory_space<vmem>>, %arg10: memref<1x2xf32, #tpu.memory_space<vmem>>, %arg11: memref<2x2xf32, #tpu.memory_space<vmem>>) attributes {dimension_semantics = [], scalar_prefetch = 0 : i64, scratch_operands = 0 : i64, tpu.core_type = #tpu.core_type<tc>} {
    %c0 = arith.constant 0 : index
    %c0_0 = arith.constant 0 : index
    %0 = vector.load %arg3[%c0, %c0_0] : memref<32x96xbf16, #tpu.memory_space<vmem>>, vector<32x96xbf16>
    %c0_1 = arith.constant 0 : index
    %c0_2 = arith.constant 0 : index
    %1 = vector.load %arg4[%c0_1, %c0_2] : memref<1x128xf32, #tpu.memory_space<vmem>>, vector<1x128xf32>
    %2 = vector.extract_strided_slice %1 {offsets = [0, 96], sizes = [1, 32], strides = [1, 1]} : vector<1x128xf32> to vector<1x32xf32>
    %c0_3 = arith.constant 0 : index
    %c0_4 = arith.constant 0 : index
    %3 = vector.load %arg5[%c0_3, %c0_4] : memref<64x128xbf16, #tpu.memory_space<vmem>>, vector<64x128xbf16>
    %c0_5 = arith.constant 0 : index
    %c0_6 = arith.constant 0 : index
    %4 = vector.load %arg6[%c0_5, %c0_6] : memref<1x128xf32, #tpu.memory_space<vmem>>, vector<1x128xf32>
    %c0_7 = arith.constant 0 : index
    %c0_8 = arith.constant 0 : index
    %5 = vector.load %arg0[%c0_7, %c0_8] : memref<16x16xf32, #tpu.memory_space<vmem>>, vector<16x16xf32>
    %6 = arith.truncf %5 : vector<16x16xf32> to vector<16x16xbf16>
    %c0_9 = arith.constant 0 : index
    %c0_10 = arith.constant 0 : index
    %7 = vector.load %arg2[%c0_9, %c0_10] : memref<16x96xbf16, #tpu.memory_space<vmem>>, vector<16x96xbf16>
    %cst = arith.constant dense<0.000000e+00> : vector<16x96xf32>
    %8 = tpu.matmul %6, %7, %cst {dimension_numbers = #tpu.dot_dimension_numbers<[1], [0], [0], [1], [0, 0, 1, 1], [], []>} : vector<16x16xbf16>, vector<16x96xbf16>, vector<16x96xf32> -> vector<16x96xf32>
    %9 = vector.extract_strided_slice %1 {offsets = [0, 0], sizes = [1, 96], strides = [1, 1]} : vector<1x128xf32> to vector<1x96xf32>
    %10 = vector.broadcast %9 : vector<1x96xf32> to vector<16x96xf32>
    %11 = arith.addf %8, %10 : vector<16x96xf32>
    %c0_11 = arith.constant 0 : index
    %c0_12 = arith.constant 0 : index
    %c0_13 = arith.constant 0 : index
    %12 = vector.load %arg1[%c0_11, %c0_12, %c0_13] : memref<2x2x32xf32, #tpu.memory_space<vmem>>, vector<1x2x32xf32>
    %13 = vector.shape_cast %12 : vector<1x2x32xf32> to vector<2x32xf32>
    %c1 = arith.constant 1 : index
    %c0_14 = arith.constant 0 : index
    %c0_15 = arith.constant 0 : index
    %14 = vector.load %arg1[%c1, %c0_14, %c0_15] : memref<2x2x32xf32, #tpu.memory_space<vmem>>, vector<1x2x32xf32>
    %15 = vector.shape_cast %14 : vector<1x2x32xf32> to vector<2x32xf32>
    %16 = arith.truncf %13 : vector<2x32xf32> to vector<2x32xbf16>
    %cst_16 = arith.constant dense<0.000000e+00> : vector<2x96xf32>
    %17 = tpu.matmul %16, %0, %cst_16 {dimension_numbers = #tpu.dot_dimension_numbers<[1], [0], [0], [1], [0, 0, 1, 1], [], []>} : vector<2x32xbf16>, vector<32x96xbf16>, vector<2x96xf32> -> vector<2x96xf32>
    %18 = vector.extract_strided_slice %11 {offsets = [0, 0], sizes = [2, 96], strides = [1, 1]} : vector<16x96xf32> to vector<2x96xf32>
    %19 = vector.extract_strided_slice %18 {offsets = [0, 0], sizes = [2, 64], strides = [1, 1]} : vector<2x96xf32> to vector<2x64xf32>
    %20 = vector.extract_strided_slice %17 {offsets = [0, 0], sizes = [2, 64], strides = [1, 1]} : vector<2x96xf32> to vector<2x64xf32>
    %21 = arith.addf %19, %20 : vector<2x64xf32>
    %22 = arith.negf %21 : vector<2x64xf32>
    %23 = math.exp %22 : vector<2x64xf32>
    %cst_17 = arith.constant 1.000000e+00 : f32
    %24 = vector.broadcast %cst_17 : f32 to vector<2x64xf32>
    %25 = arith.addf %24, %23 : vector<2x64xf32>
    %26 = arith.divf %24, %25 : vector<2x64xf32>
    %27 = vector.extract_strided_slice %26 {offsets = [0, 0], sizes = [2, 32], strides = [1, 1]} : vector<2x64xf32> to vector<2x32xf32>
    %28 = vector.extract_strided_slice %26 {offsets = [0, 32], sizes = [2, 32], strides = [1, 1]} : vector<2x64xf32> to vector<2x32xf32>
    %29 = vector.extract_strided_slice %18 {offsets = [0, 64], sizes = [2, 32], strides = [1, 1]} : vector<2x96xf32> to vector<2x32xf32>
    %30 = vector.extract_strided_slice %17 {offsets = [0, 64], sizes = [2, 32], strides = [1, 1]} : vector<2x96xf32> to vector<2x32xf32>
    %31 = vector.broadcast %2 : vector<1x32xf32> to vector<2x32xf32>
    %32 = arith.addf %30, %31 : vector<2x32xf32>
    %33 = arith.mulf %27, %32 : vector<2x32xf32>
    %34 = arith.addf %29, %33 : vector<2x32xf32>
    %35 = math.tanh %34 : vector<2x32xf32>
    %cst_18 = arith.constant 1.000000e+00 : f32
    %36 = vector.broadcast %cst_18 : f32 to vector<2x32xf32>
    %37 = arith.subf %36, %28 : vector<2x32xf32>
    %38 = arith.mulf %37, %35 : vector<2x32xf32>
    %39 = arith.mulf %28, %13 : vector<2x32xf32>
    %40 = arith.addf %38, %39 : vector<2x32xf32>
    %41 = tpu.concatenate %40, %15 in 1 : vector<2x32xf32>, vector<2x32xf32> -> vector<2x64xf32>
    %42 = arith.truncf %41 : vector<2x64xf32> to vector<2x64xbf16>
    %cst_19 = arith.constant dense<0.000000e+00> : vector<2x128xf32>
    %43 = tpu.matmul %42, %3, %cst_19 {dimension_numbers = #tpu.dot_dimension_numbers<[1], [0], [0], [1], [0, 0, 1, 1], [], []>} : vector<2x64xbf16>, vector<64x128xbf16>, vector<2x128xf32> -> vector<2x128xf32>
    %44 = vector.broadcast %4 : vector<1x128xf32> to vector<2x128xf32>
    %45 = arith.addf %43, %44 : vector<2x128xf32>
    %46 = vector.extract_strided_slice %45 {offsets = [0, 0], sizes = [2, 64], strides = [1, 1]} : vector<2x128xf32> to vector<2x64xf32>
    %47 = arith.negf %46 : vector<2x64xf32>
    %48 = math.exp %47 : vector<2x64xf32>
    %cst_20 = arith.constant 1.000000e+00 : f32
    %49 = vector.broadcast %cst_20 : f32 to vector<2x64xf32>
    %50 = arith.addf %49, %48 : vector<2x64xf32>
    %51 = arith.divf %49, %50 : vector<2x64xf32>
    %52 = vector.extract_strided_slice %51 {offsets = [0, 0], sizes = [2, 32], strides = [1, 1]} : vector<2x64xf32> to vector<2x32xf32>
    %53 = vector.extract_strided_slice %51 {offsets = [0, 32], sizes = [2, 32], strides = [1, 1]} : vector<2x64xf32> to vector<2x32xf32>
    %54 = vector.extract_strided_slice %45 {offsets = [0, 64], sizes = [2, 32], strides = [1, 1]} : vector<2x128xf32> to vector<2x32xf32>
    %55 = vector.extract_strided_slice %45 {offsets = [0, 96], sizes = [2, 32], strides = [1, 1]} : vector<2x128xf32> to vector<2x32xf32>
    %56 = arith.mulf %52, %55 : vector<2x32xf32>
    %57 = arith.addf %54, %56 : vector<2x32xf32>
    %58 = math.tanh %57 : vector<2x32xf32>
    %cst_21 = arith.constant 1.000000e+00 : f32
    %59 = vector.broadcast %cst_21 : f32 to vector<2x32xf32>
    %60 = arith.subf %59, %53 : vector<2x32xf32>
    %61 = arith.mulf %60, %58 : vector<2x32xf32>
    %62 = arith.mulf %53, %15 : vector<2x32xf32>
    %63 = arith.addf %61, %62 : vector<2x32xf32>
    %64 = arith.truncf %40 : vector<2x32xf32> to vector<2x32xbf16>
    %cst_22 = arith.constant dense<0.000000e+00> : vector<2x96xf32>
    %65 = tpu.matmul %64, %0, %cst_22 {dimension_numbers = #tpu.dot_dimension_numbers<[1], [0], [0], [1], [0, 0, 1, 1], [], []>} : vector<2x32xbf16>, vector<32x96xbf16>, vector<2x96xf32> -> vector<2x96xf32>
    %66 = vector.extract_strided_slice %11 {offsets = [2, 0], sizes = [2, 96], strides = [1, 1]} : vector<16x96xf32> to vector<2x96xf32>
    %67 = vector.extract_strided_slice %66 {offsets = [0, 0], sizes = [2, 64], strides = [1, 1]} : vector<2x96xf32> to vector<2x64xf32>
    %68 = vector.extract_strided_slice %65 {offsets = [0, 0], sizes = [2, 64], strides = [1, 1]} : vector<2x96xf32> to vector<2x64xf32>
    %69 = arith.addf %67, %68 : vector<2x64xf32>
    %70 = arith.negf %69 : vector<2x64xf32>
    %71 = math.exp %70 : vector<2x64xf32>
    %cst_23 = arith.constant 1.000000e+00 : f32
    %72 = vector.broadcast %cst_23 : f32 to vector<2x64xf32>
    %73 = arith.addf %72, %71 : vector<2x64xf32>
    %74 = arith.divf %72, %73 : vector<2x64xf32>
    %75 = vector.extract_strided_slice %74 {offsets = [0, 0], sizes = [2, 32], strides = [1, 1]} : vector<2x64xf32> to vector<2x32xf32>
    %76 = vector.extract_strided_slice %74 {offsets = [0, 32], sizes = [2, 32], strides = [1, 1]} : vector<2x64xf32> to vector<2x32xf32>
    %77 = vector.extract_strided_slice %66 {offsets = [0, 64], sizes = [2, 32], strides = [1, 1]} : vector<2x96xf32> to vector<2x32xf32>
    %78 = vector.extract_strided_slice %65 {offsets = [0, 64], sizes = [2, 32], strides = [1, 1]} : vector<2x96xf32> to vector<2x32xf32>
    %79 = vector.broadcast %2 : vector<1x32xf32> to vector<2x32xf32>
    %80 = arith.addf %78, %79 : vector<2x32xf32>
    %81 = arith.mulf %75, %80 : vector<2x32xf32>
    %82 = arith.addf %77, %81 : vector<2x32xf32>
    %83 = math.tanh %82 : vector<2x32xf32>
    %cst_24 = arith.constant 1.000000e+00 : f32
    %84 = vector.broadcast %cst_24 : f32 to vector<2x32xf32>
    %85 = arith.subf %84, %76 : vector<2x32xf32>
    %86 = arith.mulf %85, %83 : vector<2x32xf32>
    %87 = arith.mulf %76, %40 : vector<2x32xf32>
    %88 = arith.addf %86, %87 : vector<2x32xf32>
    %89 = tpu.concatenate %88, %63 in 1 : vector<2x32xf32>, vector<2x32xf32> -> vector<2x64xf32>
    %90 = arith.truncf %89 : vector<2x64xf32> to vector<2x64xbf16>
    %cst_25 = arith.constant dense<0.000000e+00> : vector<2x128xf32>
    %91 = tpu.matmul %90, %3, %cst_25 {dimension_numbers = #tpu.dot_dimension_numbers<[1], [0], [0], [1], [0, 0, 1, 1], [], []>} : vector<2x64xbf16>, vector<64x128xbf16>, vector<2x128xf32> -> vector<2x128xf32>
    %92 = vector.broadcast %4 : vector<1x128xf32> to vector<2x128xf32>
    %93 = arith.addf %91, %92 : vector<2x128xf32>
    %94 = vector.extract_strided_slice %93 {offsets = [0, 0], sizes = [2, 64], strides = [1, 1]} : vector<2x128xf32> to vector<2x64xf32>
    %95 = arith.negf %94 : vector<2x64xf32>
    %96 = math.exp %95 : vector<2x64xf32>
    %cst_26 = arith.constant 1.000000e+00 : f32
    %97 = vector.broadcast %cst_26 : f32 to vector<2x64xf32>
    %98 = arith.addf %97, %96 : vector<2x64xf32>
    %99 = arith.divf %97, %98 : vector<2x64xf32>
    %100 = vector.extract_strided_slice %99 {offsets = [0, 0], sizes = [2, 32], strides = [1, 1]} : vector<2x64xf32> to vector<2x32xf32>
    %101 = vector.extract_strided_slice %99 {offsets = [0, 32], sizes = [2, 32], strides = [1, 1]} : vector<2x64xf32> to vector<2x32xf32>
    %102 = vector.extract_strided_slice %93 {offsets = [0, 64], sizes = [2, 32], strides = [1, 1]} : vector<2x128xf32> to vector<2x32xf32>
    %103 = vector.extract_strided_slice %93 {offsets = [0, 96], sizes = [2, 32], strides = [1, 1]} : vector<2x128xf32> to vector<2x32xf32>
    %104 = arith.mulf %100, %103 : vector<2x32xf32>
    %105 = arith.addf %102, %104 : vector<2x32xf32>
    %106 = math.tanh %105 : vector<2x32xf32>
    %cst_27 = arith.constant 1.000000e+00 : f32
    %107 = vector.broadcast %cst_27 : f32 to vector<2x32xf32>
    %108 = arith.subf %107, %101 : vector<2x32xf32>
    %109 = arith.mulf %108, %106 : vector<2x32xf32>
    %110 = arith.mulf %101, %63 : vector<2x32xf32>
    %111 = arith.addf %109, %110 : vector<2x32xf32>
    %112 = arith.truncf %88 : vector<2x32xf32> to vector<2x32xbf16>
    %cst_28 = arith.constant dense<0.000000e+00> : vector<2x96xf32>
    %113 = tpu.matmul %112, %0, %cst_28 {dimension_numbers = #tpu.dot_dimension_numbers<[1], [0], [0], [1], [0, 0, 1, 1], [], []>} : vector<2x32xbf16>, vector<32x96xbf16>, vector<2x96xf32> -> vector<2x96xf32>
    %114 = vector.extract_strided_slice %11 {offsets = [4, 0], sizes = [2, 96], strides = [1, 1]} : vector<16x96xf32> to vector<2x96xf32>
    %115 = vector.extract_strided_slice %114 {offsets = [0, 0], sizes = [2, 64], strides = [1, 1]} : vector<2x96xf32> to vector<2x64xf32>
    %116 = vector.extract_strided_slice %113 {offsets = [0, 0], sizes = [2, 64], strides = [1, 1]} : vector<2x96xf32> to vector<2x64xf32>
    %117 = arith.addf %115, %116 : vector<2x64xf32>
    %118 = arith.negf %117 : vector<2x64xf32>
    %119 = math.exp %118 : vector<2x64xf32>
    %cst_29 = arith.constant 1.000000e+00 : f32
    %120 = vector.broadcast %cst_29 : f32 to vector<2x64xf32>
    %121 = arith.addf %120, %119 : vector<2x64xf32>
    %122 = arith.divf %120, %121 : vector<2x64xf32>
    %123 = vector.extract_strided_slice %122 {offsets = [0, 0], sizes = [2, 32], strides = [1, 1]} : vector<2x64xf32> to vector<2x32xf32>
    %124 = vector.extract_strided_slice %122 {offsets = [0, 32], sizes = [2, 32], strides = [1, 1]} : vector<2x64xf32> to vector<2x32xf32>
    %125 = vector.extract_strided_slice %114 {offsets = [0, 64], sizes = [2, 32], strides = [1, 1]} : vector<2x96xf32> to vector<2x32xf32>
    %126 = vector.extract_strided_slice %113 {offsets = [0, 64], sizes = [2, 32], strides = [1, 1]} : vector<2x96xf32> to vector<2x32xf32>
    %127 = vector.broadcast %2 : vector<1x32xf32> to vector<2x32xf32>
    %128 = arith.addf %126, %127 : vector<2x32xf32>
    %129 = arith.mulf %123, %128 : vector<2x32xf32>
    %130 = arith.addf %125, %129 : vector<2x32xf32>
    %131 = math.tanh %130 : vector<2x32xf32>
    %cst_30 = arith.constant 1.000000e+00 : f32
    %132 = vector.broadcast %cst_30 : f32 to vector<2x32xf32>
    %133 = arith.subf %132, %124 : vector<2x32xf32>
    %134 = arith.mulf %133, %131 : vector<2x32xf32>
    %135 = arith.mulf %124, %88 : vector<2x32xf32>
    %136 = arith.addf %134, %135 : vector<2x32xf32>
    %137 = tpu.concatenate %136, %111 in 1 : vector<2x32xf32>, vector<2x32xf32> -> vector<2x64xf32>
    %138 = arith.truncf %137 : vector<2x64xf32> to vector<2x64xbf16>
    %cst_31 = arith.constant dense<0.000000e+00> : vector<2x128xf32>
    %139 = tpu.matmul %138, %3, %cst_31 {dimension_numbers = #tpu.dot_dimension_numbers<[1], [0], [0], [1], [0, 0, 1, 1], [], []>} : vector<2x64xbf16>, vector<64x128xbf16>, vector<2x128xf32> -> vector<2x128xf32>
    %140 = vector.broadcast %4 : vector<1x128xf32> to vector<2x128xf32>
    %141 = arith.addf %139, %140 : vector<2x128xf32>
    %142 = vector.extract_strided_slice %141 {offsets = [0, 0], sizes = [2, 64], strides = [1, 1]} : vector<2x128xf32> to vector<2x64xf32>
    %143 = arith.negf %142 : vector<2x64xf32>
    %144 = math.exp %143 : vector<2x64xf32>
    %cst_32 = arith.constant 1.000000e+00 : f32
    %145 = vector.broadcast %cst_32 : f32 to vector<2x64xf32>
    %146 = arith.addf %145, %144 : vector<2x64xf32>
    %147 = arith.divf %145, %146 : vector<2x64xf32>
    %148 = vector.extract_strided_slice %147 {offsets = [0, 0], sizes = [2, 32], strides = [1, 1]} : vector<2x64xf32> to vector<2x32xf32>
    %149 = vector.extract_strided_slice %147 {offsets = [0, 32], sizes = [2, 32], strides = [1, 1]} : vector<2x64xf32> to vector<2x32xf32>
    %150 = vector.extract_strided_slice %141 {offsets = [0, 64], sizes = [2, 32], strides = [1, 1]} : vector<2x128xf32> to vector<2x32xf32>
    %151 = vector.extract_strided_slice %141 {offsets = [0, 96], sizes = [2, 32], strides = [1, 1]} : vector<2x128xf32> to vector<2x32xf32>
    %152 = arith.mulf %148, %151 : vector<2x32xf32>
    %153 = arith.addf %150, %152 : vector<2x32xf32>
    %154 = math.tanh %153 : vector<2x32xf32>
    %cst_33 = arith.constant 1.000000e+00 : f32
    %155 = vector.broadcast %cst_33 : f32 to vector<2x32xf32>
    %156 = arith.subf %155, %149 : vector<2x32xf32>
    %157 = arith.mulf %156, %154 : vector<2x32xf32>
    %158 = arith.mulf %149, %111 : vector<2x32xf32>
    %159 = arith.addf %157, %158 : vector<2x32xf32>
    %160 = arith.truncf %136 : vector<2x32xf32> to vector<2x32xbf16>
    %cst_34 = arith.constant dense<0.000000e+00> : vector<2x96xf32>
    %161 = tpu.matmul %160, %0, %cst_34 {dimension_numbers = #tpu.dot_dimension_numbers<[1], [0], [0], [1], [0, 0, 1, 1], [], []>} : vector<2x32xbf16>, vector<32x96xbf16>, vector<2x96xf32> -> vector<2x96xf32>
    %162 = vector.extract_strided_slice %11 {offsets = [6, 0], sizes = [2, 96], strides = [1, 1]} : vector<16x96xf32> to vector<2x96xf32>
    %163 = vector.extract_strided_slice %162 {offsets = [0, 0], sizes = [2, 64], strides = [1, 1]} : vector<2x96xf32> to vector<2x64xf32>
    %164 = vector.extract_strided_slice %161 {offsets = [0, 0], sizes = [2, 64], strides = [1, 1]} : vector<2x96xf32> to vector<2x64xf32>
    %165 = arith.addf %163, %164 : vector<2x64xf32>
    %166 = arith.negf %165 : vector<2x64xf32>
    %167 = math.exp %166 : vector<2x64xf32>
    %cst_35 = arith.constant 1.000000e+00 : f32
    %168 = vector.broadcast %cst_35 : f32 to vector<2x64xf32>
    %169 = arith.addf %168, %167 : vector<2x64xf32>
    %170 = arith.divf %168, %169 : vector<2x64xf32>
    %171 = vector.extract_strided_slice %170 {offsets = [0, 0], sizes = [2, 32], strides = [1, 1]} : vector<2x64xf32> to vector<2x32xf32>
    %172 = vector.extract_strided_slice %170 {offsets = [0, 32], sizes = [2, 32], strides = [1, 1]} : vector<2x64xf32> to vector<2x32xf32>
    %173 = vector.extract_strided_slice %162 {offsets = [0, 64], sizes = [2, 32], strides = [1, 1]} : vector<2x96xf32> to vector<2x32xf32>
    %174 = vector.extract_strided_slice %161 {offsets = [0, 64], sizes = [2, 32], strides = [1, 1]} : vector<2x96xf32> to vector<2x32xf32>
    %175 = vector.broadcast %2 : vector<1x32xf32> to vector<2x32xf32>
    %176 = arith.addf %174, %175 : vector<2x32xf32>
    %177 = arith.mulf %171, %176 : vector<2x32xf32>
    %178 = arith.addf %173, %177 : vector<2x32xf32>
    %179 = math.tanh %178 : vector<2x32xf32>
    %cst_36 = arith.constant 1.000000e+00 : f32
    %180 = vector.broadcast %cst_36 : f32 to vector<2x32xf32>
    %181 = arith.subf %180, %172 : vector<2x32xf32>
    %182 = arith.mulf %181, %179 : vector<2x32xf32>
    %183 = arith.mulf %172, %136 : vector<2x32xf32>
    %184 = arith.addf %182, %183 : vector<2x32xf32>
    %185 = tpu.concatenate %184, %159 in 1 : vector<2x32xf32>, vector<2x32xf32> -> vector<2x64xf32>
    %186 = arith.truncf %185 : vector<2x64xf32> to vector<2x64xbf16>
    %cst_37 = arith.constant dense<0.000000e+00> : vector<2x128xf32>
    %187 = tpu.matmul %186, %3, %cst_37 {dimension_numbers = #tpu.dot_dimension_numbers<[1], [0], [0], [1], [0, 0, 1, 1], [], []>} : vector<2x64xbf16>, vector<64x128xbf16>, vector<2x128xf32> -> vector<2x128xf32>
    %188 = vector.broadcast %4 : vector<1x128xf32> to vector<2x128xf32>
    %189 = arith.addf %187, %188 : vector<2x128xf32>
    %190 = vector.extract_strided_slice %189 {offsets = [0, 0], sizes = [2, 64], strides = [1, 1]} : vector<2x128xf32> to vector<2x64xf32>
    %191 = arith.negf %190 : vector<2x64xf32>
    %192 = math.exp %191 : vector<2x64xf32>
    %cst_38 = arith.constant 1.000000e+00 : f32
    %193 = vector.broadcast %cst_38 : f32 to vector<2x64xf32>
    %194 = arith.addf %193, %192 : vector<2x64xf32>
    %195 = arith.divf %193, %194 : vector<2x64xf32>
    %196 = vector.extract_strided_slice %195 {offsets = [0, 0], sizes = [2, 32], strides = [1, 1]} : vector<2x64xf32> to vector<2x32xf32>
    %197 = vector.extract_strided_slice %195 {offsets = [0, 32], sizes = [2, 32], strides = [1, 1]} : vector<2x64xf32> to vector<2x32xf32>
    %198 = vector.extract_strided_slice %189 {offsets = [0, 64], sizes = [2, 32], strides = [1, 1]} : vector<2x128xf32> to vector<2x32xf32>
    %199 = vector.extract_strided_slice %189 {offsets = [0, 96], sizes = [2, 32], strides = [1, 1]} : vector<2x128xf32> to vector<2x32xf32>
    %200 = arith.mulf %196, %199 : vector<2x32xf32>
    %201 = arith.addf %198, %200 : vector<2x32xf32>
    %202 = math.tanh %201 : vector<2x32xf32>
    %cst_39 = arith.constant 1.000000e+00 : f32
    %203 = vector.broadcast %cst_39 : f32 to vector<2x32xf32>
    %204 = arith.subf %203, %197 : vector<2x32xf32>
    %205 = arith.mulf %204, %202 : vector<2x32xf32>
    %206 = arith.mulf %197, %159 : vector<2x32xf32>
    %207 = arith.addf %205, %206 : vector<2x32xf32>
    %208 = arith.truncf %184 : vector<2x32xf32> to vector<2x32xbf16>
    %cst_40 = arith.constant dense<0.000000e+00> : vector<2x96xf32>
    %209 = tpu.matmul %208, %0, %cst_40 {dimension_numbers = #tpu.dot_dimension_numbers<[1], [0], [0], [1], [0, 0, 1, 1], [], []>} : vector<2x32xbf16>, vector<32x96xbf16>, vector<2x96xf32> -> vector<2x96xf32>
    %210 = vector.extract_strided_slice %11 {offsets = [8, 0], sizes = [2, 96], strides = [1, 1]} : vector<16x96xf32> to vector<2x96xf32>
    %211 = vector.extract_strided_slice %210 {offsets = [0, 0], sizes = [2, 64], strides = [1, 1]} : vector<2x96xf32> to vector<2x64xf32>
    %212 = vector.extract_strided_slice %209 {offsets = [0, 0], sizes = [2, 64], strides = [1, 1]} : vector<2x96xf32> to vector<2x64xf32>
    %213 = arith.addf %211, %212 : vector<2x64xf32>
    %214 = arith.negf %213 : vector<2x64xf32>
    %215 = math.exp %214 : vector<2x64xf32>
    %cst_41 = arith.constant 1.000000e+00 : f32
    %216 = vector.broadcast %cst_41 : f32 to vector<2x64xf32>
    %217 = arith.addf %216, %215 : vector<2x64xf32>
    %218 = arith.divf %216, %217 : vector<2x64xf32>
    %219 = vector.extract_strided_slice %218 {offsets = [0, 0], sizes = [2, 32], strides = [1, 1]} : vector<2x64xf32> to vector<2x32xf32>
    %220 = vector.extract_strided_slice %218 {offsets = [0, 32], sizes = [2, 32], strides = [1, 1]} : vector<2x64xf32> to vector<2x32xf32>
    %221 = vector.extract_strided_slice %210 {offsets = [0, 64], sizes = [2, 32], strides = [1, 1]} : vector<2x96xf32> to vector<2x32xf32>
    %222 = vector.extract_strided_slice %209 {offsets = [0, 64], sizes = [2, 32], strides = [1, 1]} : vector<2x96xf32> to vector<2x32xf32>
    %223 = vector.broadcast %2 : vector<1x32xf32> to vector<2x32xf32>
    %224 = arith.addf %222, %223 : vector<2x32xf32>
    %225 = arith.mulf %219, %224 : vector<2x32xf32>
    %226 = arith.addf %221, %225 : vector<2x32xf32>
    %227 = math.tanh %226 : vector<2x32xf32>
    %cst_42 = arith.constant 1.000000e+00 : f32
    %228 = vector.broadcast %cst_42 : f32 to vector<2x32xf32>
    %229 = arith.subf %228, %220 : vector<2x32xf32>
    %230 = arith.mulf %229, %227 : vector<2x32xf32>
    %231 = arith.mulf %220, %184 : vector<2x32xf32>
    %232 = arith.addf %230, %231 : vector<2x32xf32>
    %233 = tpu.concatenate %232, %207 in 1 : vector<2x32xf32>, vector<2x32xf32> -> vector<2x64xf32>
    %234 = arith.truncf %233 : vector<2x64xf32> to vector<2x64xbf16>
    %cst_43 = arith.constant dense<0.000000e+00> : vector<2x128xf32>
    %235 = tpu.matmul %234, %3, %cst_43 {dimension_numbers = #tpu.dot_dimension_numbers<[1], [0], [0], [1], [0, 0, 1, 1], [], []>} : vector<2x64xbf16>, vector<64x128xbf16>, vector<2x128xf32> -> vector<2x128xf32>
    %236 = vector.broadcast %4 : vector<1x128xf32> to vector<2x128xf32>
    %237 = arith.addf %235, %236 : vector<2x128xf32>
    %238 = vector.extract_strided_slice %237 {offsets = [0, 0], sizes = [2, 64], strides = [1, 1]} : vector<2x128xf32> to vector<2x64xf32>
    %239 = arith.negf %238 : vector<2x64xf32>
    %240 = math.exp %239 : vector<2x64xf32>
    %cst_44 = arith.constant 1.000000e+00 : f32
    %241 = vector.broadcast %cst_44 : f32 to vector<2x64xf32>
    %242 = arith.addf %241, %240 : vector<2x64xf32>
    %243 = arith.divf %241, %242 : vector<2x64xf32>
    %244 = vector.extract_strided_slice %243 {offsets = [0, 0], sizes = [2, 32], strides = [1, 1]} : vector<2x64xf32> to vector<2x32xf32>
    %245 = vector.extract_strided_slice %243 {offsets = [0, 32], sizes = [2, 32], strides = [1, 1]} : vector<2x64xf32> to vector<2x32xf32>
    %246 = vector.extract_strided_slice %237 {offsets = [0, 64], sizes = [2, 32], strides = [1, 1]} : vector<2x128xf32> to vector<2x32xf32>
    %247 = vector.extract_strided_slice %237 {offsets = [0, 96], sizes = [2, 32], strides = [1, 1]} : vector<2x128xf32> to vector<2x32xf32>
    %248 = arith.mulf %244, %247 : vector<2x32xf32>
    %249 = arith.addf %246, %248 : vector<2x32xf32>
    %250 = math.tanh %249 : vector<2x32xf32>
    %cst_45 = arith.constant 1.000000e+00 : f32
    %251 = vector.broadcast %cst_45 : f32 to vector<2x32xf32>
    %252 = arith.subf %251, %245 : vector<2x32xf32>
    %253 = arith.mulf %252, %250 : vector<2x32xf32>
    %254 = arith.mulf %245, %207 : vector<2x32xf32>
    %255 = arith.addf %253, %254 : vector<2x32xf32>
    %256 = arith.truncf %232 : vector<2x32xf32> to vector<2x32xbf16>
    %cst_46 = arith.constant dense<0.000000e+00> : vector<2x96xf32>
    %257 = tpu.matmul %256, %0, %cst_46 {dimension_numbers = #tpu.dot_dimension_numbers<[1], [0], [0], [1], [0, 0, 1, 1], [], []>} : vector<2x32xbf16>, vector<32x96xbf16>, vector<2x96xf32> -> vector<2x96xf32>
    %258 = vector.extract_strided_slice %11 {offsets = [10, 0], sizes = [2, 96], strides = [1, 1]} : vector<16x96xf32> to vector<2x96xf32>
    %259 = vector.extract_strided_slice %258 {offsets = [0, 0], sizes = [2, 64], strides = [1, 1]} : vector<2x96xf32> to vector<2x64xf32>
    %260 = vector.extract_strided_slice %257 {offsets = [0, 0], sizes = [2, 64], strides = [1, 1]} : vector<2x96xf32> to vector<2x64xf32>
    %261 = arith.addf %259, %260 : vector<2x64xf32>
    %262 = arith.negf %261 : vector<2x64xf32>
    %263 = math.exp %262 : vector<2x64xf32>
    %cst_47 = arith.constant 1.000000e+00 : f32
    %264 = vector.broadcast %cst_47 : f32 to vector<2x64xf32>
    %265 = arith.addf %264, %263 : vector<2x64xf32>
    %266 = arith.divf %264, %265 : vector<2x64xf32>
    %267 = vector.extract_strided_slice %266 {offsets = [0, 0], sizes = [2, 32], strides = [1, 1]} : vector<2x64xf32> to vector<2x32xf32>
    %268 = vector.extract_strided_slice %266 {offsets = [0, 32], sizes = [2, 32], strides = [1, 1]} : vector<2x64xf32> to vector<2x32xf32>
    %269 = vector.extract_strided_slice %258 {offsets = [0, 64], sizes = [2, 32], strides = [1, 1]} : vector<2x96xf32> to vector<2x32xf32>
    %270 = vector.extract_strided_slice %257 {offsets = [0, 64], sizes = [2, 32], strides = [1, 1]} : vector<2x96xf32> to vector<2x32xf32>
    %271 = vector.broadcast %2 : vector<1x32xf32> to vector<2x32xf32>
    %272 = arith.addf %270, %271 : vector<2x32xf32>
    %273 = arith.mulf %267, %272 : vector<2x32xf32>
    %274 = arith.addf %269, %273 : vector<2x32xf32>
    %275 = math.tanh %274 : vector<2x32xf32>
    %cst_48 = arith.constant 1.000000e+00 : f32
    %276 = vector.broadcast %cst_48 : f32 to vector<2x32xf32>
    %277 = arith.subf %276, %268 : vector<2x32xf32>
    %278 = arith.mulf %277, %275 : vector<2x32xf32>
    %279 = arith.mulf %268, %232 : vector<2x32xf32>
    %280 = arith.addf %278, %279 : vector<2x32xf32>
    %281 = tpu.concatenate %280, %255 in 1 : vector<2x32xf32>, vector<2x32xf32> -> vector<2x64xf32>
    %282 = arith.truncf %281 : vector<2x64xf32> to vector<2x64xbf16>
    %cst_49 = arith.constant dense<0.000000e+00> : vector<2x128xf32>
    %283 = tpu.matmul %282, %3, %cst_49 {dimension_numbers = #tpu.dot_dimension_numbers<[1], [0], [0], [1], [0, 0, 1, 1], [], []>} : vector<2x64xbf16>, vector<64x128xbf16>, vector<2x128xf32> -> vector<2x128xf32>
    %284 = vector.broadcast %4 : vector<1x128xf32> to vector<2x128xf32>
    %285 = arith.addf %283, %284 : vector<2x128xf32>
    %286 = vector.extract_strided_slice %285 {offsets = [0, 0], sizes = [2, 64], strides = [1, 1]} : vector<2x128xf32> to vector<2x64xf32>
    %287 = arith.negf %286 : vector<2x64xf32>
    %288 = math.exp %287 : vector<2x64xf32>
    %cst_50 = arith.constant 1.000000e+00 : f32
    %289 = vector.broadcast %cst_50 : f32 to vector<2x64xf32>
    %290 = arith.addf %289, %288 : vector<2x64xf32>
    %291 = arith.divf %289, %290 : vector<2x64xf32>
    %292 = vector.extract_strided_slice %291 {offsets = [0, 0], sizes = [2, 32], strides = [1, 1]} : vector<2x64xf32> to vector<2x32xf32>
    %293 = vector.extract_strided_slice %291 {offsets = [0, 32], sizes = [2, 32], strides = [1, 1]} : vector<2x64xf32> to vector<2x32xf32>
    %294 = vector.extract_strided_slice %285 {offsets = [0, 64], sizes = [2, 32], strides = [1, 1]} : vector<2x128xf32> to vector<2x32xf32>
    %295 = vector.extract_strided_slice %285 {offsets = [0, 96], sizes = [2, 32], strides = [1, 1]} : vector<2x128xf32> to vector<2x32xf32>
    %296 = arith.mulf %292, %295 : vector<2x32xf32>
    %297 = arith.addf %294, %296 : vector<2x32xf32>
    %298 = math.tanh %297 : vector<2x32xf32>
    %cst_51 = arith.constant 1.000000e+00 : f32
    %299 = vector.broadcast %cst_51 : f32 to vector<2x32xf32>
    %300 = arith.subf %299, %293 : vector<2x32xf32>
    %301 = arith.mulf %300, %298 : vector<2x32xf32>
    %302 = arith.mulf %293, %255 : vector<2x32xf32>
    %303 = arith.addf %301, %302 : vector<2x32xf32>
    %304 = arith.truncf %280 : vector<2x32xf32> to vector<2x32xbf16>
    %cst_52 = arith.constant dense<0.000000e+00> : vector<2x96xf32>
    %305 = tpu.matmul %304, %0, %cst_52 {dimension_numbers = #tpu.dot_dimension_numbers<[1], [0], [0], [1], [0, 0, 1, 1], [], []>} : vector<2x32xbf16>, vector<32x96xbf16>, vector<2x96xf32> -> vector<2x96xf32>
    %306 = vector.extract_strided_slice %11 {offsets = [12, 0], sizes = [2, 96], strides = [1, 1]} : vector<16x96xf32> to vector<2x96xf32>
    %307 = vector.extract_strided_slice %306 {offsets = [0, 0], sizes = [2, 64], strides = [1, 1]} : vector<2x96xf32> to vector<2x64xf32>
    %308 = vector.extract_strided_slice %305 {offsets = [0, 0], sizes = [2, 64], strides = [1, 1]} : vector<2x96xf32> to vector<2x64xf32>
    %309 = arith.addf %307, %308 : vector<2x64xf32>
    %310 = arith.negf %309 : vector<2x64xf32>
    %311 = math.exp %310 : vector<2x64xf32>
    %cst_53 = arith.constant 1.000000e+00 : f32
    %312 = vector.broadcast %cst_53 : f32 to vector<2x64xf32>
    %313 = arith.addf %312, %311 : vector<2x64xf32>
    %314 = arith.divf %312, %313 : vector<2x64xf32>
    %315 = vector.extract_strided_slice %314 {offsets = [0, 0], sizes = [2, 32], strides = [1, 1]} : vector<2x64xf32> to vector<2x32xf32>
    %316 = vector.extract_strided_slice %314 {offsets = [0, 32], sizes = [2, 32], strides = [1, 1]} : vector<2x64xf32> to vector<2x32xf32>
    %317 = vector.extract_strided_slice %306 {offsets = [0, 64], sizes = [2, 32], strides = [1, 1]} : vector<2x96xf32> to vector<2x32xf32>
    %318 = vector.extract_strided_slice %305 {offsets = [0, 64], sizes = [2, 32], strides = [1, 1]} : vector<2x96xf32> to vector<2x32xf32>
    %319 = vector.broadcast %2 : vector<1x32xf32> to vector<2x32xf32>
    %320 = arith.addf %318, %319 : vector<2x32xf32>
    %321 = arith.mulf %315, %320 : vector<2x32xf32>
    %322 = arith.addf %317, %321 : vector<2x32xf32>
    %323 = math.tanh %322 : vector<2x32xf32>
    %cst_54 = arith.constant 1.000000e+00 : f32
    %324 = vector.broadcast %cst_54 : f32 to vector<2x32xf32>
    %325 = arith.subf %324, %316 : vector<2x32xf32>
    %326 = arith.mulf %325, %323 : vector<2x32xf32>
    %327 = arith.mulf %316, %280 : vector<2x32xf32>
    %328 = arith.addf %326, %327 : vector<2x32xf32>
    %329 = tpu.concatenate %328, %303 in 1 : vector<2x32xf32>, vector<2x32xf32> -> vector<2x64xf32>
    %330 = arith.truncf %329 : vector<2x64xf32> to vector<2x64xbf16>
    %cst_55 = arith.constant dense<0.000000e+00> : vector<2x128xf32>
    %331 = tpu.matmul %330, %3, %cst_55 {dimension_numbers = #tpu.dot_dimension_numbers<[1], [0], [0], [1], [0, 0, 1, 1], [], []>} : vector<2x64xbf16>, vector<64x128xbf16>, vector<2x128xf32> -> vector<2x128xf32>
    %332 = vector.broadcast %4 : vector<1x128xf32> to vector<2x128xf32>
    %333 = arith.addf %331, %332 : vector<2x128xf32>
    %334 = vector.extract_strided_slice %333 {offsets = [0, 0], sizes = [2, 64], strides = [1, 1]} : vector<2x128xf32> to vector<2x64xf32>
    %335 = arith.negf %334 : vector<2x64xf32>
    %336 = math.exp %335 : vector<2x64xf32>
    %cst_56 = arith.constant 1.000000e+00 : f32
    %337 = vector.broadcast %cst_56 : f32 to vector<2x64xf32>
    %338 = arith.addf %337, %336 : vector<2x64xf32>
    %339 = arith.divf %337, %338 : vector<2x64xf32>
    %340 = vector.extract_strided_slice %339 {offsets = [0, 0], sizes = [2, 32], strides = [1, 1]} : vector<2x64xf32> to vector<2x32xf32>
    %341 = vector.extract_strided_slice %339 {offsets = [0, 32], sizes = [2, 32], strides = [1, 1]} : vector<2x64xf32> to vector<2x32xf32>
    %342 = vector.extract_strided_slice %333 {offsets = [0, 64], sizes = [2, 32], strides = [1, 1]} : vector<2x128xf32> to vector<2x32xf32>
    %343 = vector.extract_strided_slice %333 {offsets = [0, 96], sizes = [2, 32], strides = [1, 1]} : vector<2x128xf32> to vector<2x32xf32>
    %344 = arith.mulf %340, %343 : vector<2x32xf32>
    %345 = arith.addf %342, %344 : vector<2x32xf32>
    %346 = math.tanh %345 : vector<2x32xf32>
    %cst_57 = arith.constant 1.000000e+00 : f32
    %347 = vector.broadcast %cst_57 : f32 to vector<2x32xf32>
    %348 = arith.subf %347, %341 : vector<2x32xf32>
    %349 = arith.mulf %348, %346 : vector<2x32xf32>
    %350 = arith.mulf %341, %303 : vector<2x32xf32>
    %351 = arith.addf %349, %350 : vector<2x32xf32>
    %352 = arith.truncf %328 : vector<2x32xf32> to vector<2x32xbf16>
    %cst_58 = arith.constant dense<0.000000e+00> : vector<2x96xf32>
    %353 = tpu.matmul %352, %0, %cst_58 {dimension_numbers = #tpu.dot_dimension_numbers<[1], [0], [0], [1], [0, 0, 1, 1], [], []>} : vector<2x32xbf16>, vector<32x96xbf16>, vector<2x96xf32> -> vector<2x96xf32>
    %354 = vector.extract_strided_slice %11 {offsets = [14, 0], sizes = [2, 96], strides = [1, 1]} : vector<16x96xf32> to vector<2x96xf32>
    %355 = vector.extract_strided_slice %354 {offsets = [0, 0], sizes = [2, 64], strides = [1, 1]} : vector<2x96xf32> to vector<2x64xf32>
    %356 = vector.extract_strided_slice %353 {offsets = [0, 0], sizes = [2, 64], strides = [1, 1]} : vector<2x96xf32> to vector<2x64xf32>
    %357 = arith.addf %355, %356 : vector<2x64xf32>
    %358 = arith.negf %357 : vector<2x64xf32>
    %359 = math.exp %358 : vector<2x64xf32>
    %cst_59 = arith.constant 1.000000e+00 : f32
    %360 = vector.broadcast %cst_59 : f32 to vector<2x64xf32>
    %361 = arith.addf %360, %359 : vector<2x64xf32>
    %362 = arith.divf %360, %361 : vector<2x64xf32>
    %363 = vector.extract_strided_slice %362 {offsets = [0, 0], sizes = [2, 32], strides = [1, 1]} : vector<2x64xf32> to vector<2x32xf32>
    %364 = vector.extract_strided_slice %362 {offsets = [0, 32], sizes = [2, 32], strides = [1, 1]} : vector<2x64xf32> to vector<2x32xf32>
    %365 = vector.extract_strided_slice %354 {offsets = [0, 64], sizes = [2, 32], strides = [1, 1]} : vector<2x96xf32> to vector<2x32xf32>
    %366 = vector.extract_strided_slice %353 {offsets = [0, 64], sizes = [2, 32], strides = [1, 1]} : vector<2x96xf32> to vector<2x32xf32>
    %367 = vector.broadcast %2 : vector<1x32xf32> to vector<2x32xf32>
    %368 = arith.addf %366, %367 : vector<2x32xf32>
    %369 = arith.mulf %363, %368 : vector<2x32xf32>
    %370 = arith.addf %365, %369 : vector<2x32xf32>
    %371 = math.tanh %370 : vector<2x32xf32>
    %cst_60 = arith.constant 1.000000e+00 : f32
    %372 = vector.broadcast %cst_60 : f32 to vector<2x32xf32>
    %373 = arith.subf %372, %364 : vector<2x32xf32>
    %374 = arith.mulf %373, %371 : vector<2x32xf32>
    %375 = arith.mulf %364, %328 : vector<2x32xf32>
    %376 = arith.addf %374, %375 : vector<2x32xf32>
    %377 = tpu.concatenate %376, %351 in 1 : vector<2x32xf32>, vector<2x32xf32> -> vector<2x64xf32>
    %378 = arith.truncf %377 : vector<2x64xf32> to vector<2x64xbf16>
    %cst_61 = arith.constant dense<0.000000e+00> : vector<2x128xf32>
    %379 = tpu.matmul %378, %3, %cst_61 {dimension_numbers = #tpu.dot_dimension_numbers<[1], [0], [0], [1], [0, 0, 1, 1], [], []>} : vector<2x64xbf16>, vector<64x128xbf16>, vector<2x128xf32> -> vector<2x128xf32>
    %380 = vector.broadcast %4 : vector<1x128xf32> to vector<2x128xf32>
    %381 = arith.addf %379, %380 : vector<2x128xf32>
    %382 = vector.extract_strided_slice %381 {offsets = [0, 0], sizes = [2, 64], strides = [1, 1]} : vector<2x128xf32> to vector<2x64xf32>
    %383 = arith.negf %382 : vector<2x64xf32>
    %384 = math.exp %383 : vector<2x64xf32>
    %cst_62 = arith.constant 1.000000e+00 : f32
    %385 = vector.broadcast %cst_62 : f32 to vector<2x64xf32>
    %386 = arith.addf %385, %384 : vector<2x64xf32>
    %387 = arith.divf %385, %386 : vector<2x64xf32>
    %388 = vector.extract_strided_slice %387 {offsets = [0, 0], sizes = [2, 32], strides = [1, 1]} : vector<2x64xf32> to vector<2x32xf32>
    %389 = vector.extract_strided_slice %387 {offsets = [0, 32], sizes = [2, 32], strides = [1, 1]} : vector<2x64xf32> to vector<2x32xf32>
    %390 = vector.extract_strided_slice %381 {offsets = [0, 64], sizes = [2, 32], strides = [1, 1]} : vector<2x128xf32> to vector<2x32xf32>
    %391 = vector.extract_strided_slice %381 {offsets = [0, 96], sizes = [2, 32], strides = [1, 1]} : vector<2x128xf32> to vector<2x32xf32>
    %392 = arith.mulf %388, %391 : vector<2x32xf32>
    %393 = arith.addf %390, %392 : vector<2x32xf32>
    %394 = math.tanh %393 : vector<2x32xf32>
    %cst_63 = arith.constant 1.000000e+00 : f32
    %395 = vector.broadcast %cst_63 : f32 to vector<2x32xf32>
    %396 = arith.subf %395, %389 : vector<2x32xf32>
    %397 = arith.mulf %396, %394 : vector<2x32xf32>
    %398 = arith.mulf %389, %351 : vector<2x32xf32>
    %399 = arith.addf %397, %398 : vector<2x32xf32>
    %cst_64 = arith.constant dense<0.000000e+00> : vector<2xf32>
    %400 = vector.multi_reduction <add>, %399, %cst_64 [1] : vector<2x32xf32> to vector<2xf32>
    %401 = vector.shape_cast %400 : vector<2xf32> to vector<2x1xf32>
    %cst_65 = arith.constant 3.200000e+01 : f32
    %402 = vector.broadcast %cst_65 : f32 to vector<2x1xf32>
    %403 = arith.divf %401, %402 : vector<2x1xf32>
    %404 = vector.broadcast %403 : vector<2x1xf32> to vector<2x32xf32>
    %405 = arith.subf %399, %404 : vector<2x32xf32>
    %406 = arith.mulf %405, %405 : vector<2x32xf32>
    %cst_66 = arith.constant dense<0.000000e+00> : vector<2xf32>
    %407 = vector.multi_reduction <add>, %406, %cst_66 [1] : vector<2x32xf32> to vector<2xf32>
    %408 = vector.shape_cast %407 : vector<2xf32> to vector<2x1xf32>
    %cst_67 = arith.constant 3.200000e+01 : f32
    %409 = vector.broadcast %cst_67 : f32 to vector<2x1xf32>
    %410 = arith.divf %408, %409 : vector<2x1xf32>
    %411 = vector.broadcast %403 : vector<2x1xf32> to vector<2x32xf32>
    %412 = arith.subf %399, %411 : vector<2x32xf32>
    %cst_68 = arith.constant 9.99999974E-6 : f32
    %413 = vector.broadcast %cst_68 : f32 to vector<2x1xf32>
    %414 = arith.addf %410, %413 : vector<2x1xf32>
    %415 = math.rsqrt %414 : vector<2x1xf32>
    %416 = vector.broadcast %415 : vector<2x1xf32> to vector<2x32xf32>
    %417 = arith.mulf %412, %416 : vector<2x32xf32>
    %c0_69 = arith.constant 0 : index
    %c0_70 = arith.constant 0 : index
    %418 = vector.load %arg7[%c0_69, %c0_70] : memref<1x32xf32, #tpu.memory_space<vmem>>, vector<1x32xf32>
    %419 = vector.broadcast %418 : vector<1x32xf32> to vector<2x32xf32>
    %420 = arith.mulf %417, %419 : vector<2x32xf32>
    %c0_71 = arith.constant 0 : index
    %c0_72 = arith.constant 0 : index
    %421 = vector.load %arg8[%c0_71, %c0_72] : memref<1x32xf32, #tpu.memory_space<vmem>>, vector<1x32xf32>
    %422 = vector.broadcast %421 : vector<1x32xf32> to vector<2x32xf32>
    %423 = arith.addf %420, %422 : vector<2x32xf32>
    %424 = math.tanh %423 : vector<2x32xf32>
    %c0_73 = arith.constant 0 : index
    %c0_74 = arith.constant 0 : index
    %425 = vector.load %arg9[%c0_73, %c0_74] : memref<32x2xf32, #tpu.memory_space<vmem>>, vector<32x2xf32>
    %cst_75 = arith.constant dense<0.000000e+00> : vector<2x2xf32>
    %426 = tpu.matmul %424, %425, %cst_75 {dimension_numbers = #tpu.dot_dimension_numbers<[1], [0], [0], [1], [0, 0, 1, 1], [], []>} : vector<2x32xf32>, vector<32x2xf32>, vector<2x2xf32> -> vector<2x2xf32>
    %c0_76 = arith.constant 0 : index
    %c0_77 = arith.constant 0 : index
    %427 = vector.load %arg10[%c0_76, %c0_77] : memref<1x2xf32, #tpu.memory_space<vmem>>, vector<1x2xf32>
    %428 = vector.broadcast %427 : vector<1x2xf32> to vector<2x2xf32>
    %429 = arith.addf %426, %428 : vector<2x2xf32>
    %c0_78 = arith.constant 0 : index
    %c0_79 = arith.constant 0 : index
    %430 = vector.load %arg11[%c0_78, %c0_79] : memref<2x2xf32, #tpu.memory_space<vmem>>, vector<2x2xf32>
    tpu.vector_store %arg11[%c0_78, %c0_79], %429 {strides = array<i32>} : memref<2x2xf32, #tpu.memory_space<vmem>>, vector<2x2xf32>,
    return
  }
}

</mosaic_0001>

<bundles_post_ra>
// kernel: tpu_custom_call.1
= control target key start
LH: loop header
LB: loop body
LE: loop exit
PB: predicated region body
PF: predicated region fallthrough
CT: control target
= control target key end

     0   :  { %16 = vsyncpa [#allocation3], 0  ;;  %s2605_s0 = inlined_call_operand.hbm [shape: f32[16,16], index: 0, kind: input, shape index: {}]   ;;  %s2606_s1 = inlined_call_operand.hbm [shape: f32[2,2,32], index: 1, kind: input, shape index: {}]   ;;  %s2607_s2 = inlined_call_operand.vmem [shape: bf16[16,96], index: 2, kind: input, shape index: {}]   ;;  %s2608_s3 = inlined_call_operand.hbm [shape: bf16[32,96], index: 3, kind: input, shape index: {}]   ;;  %s2609_s4 = inlined_call_operand.vmem [shape: f32[1,128], index: 4, kind: input, shape index: {}]   ;;  %s2610_s5 = inlined_call_operand.vmem [shape: bf16[64,128], index: 5, kind: input, shape index: {}]   ;;  %s2611_s6 = inlined_call_operand.vmem [shape: f32[1,128], index: 6, kind: input, shape index: {}]   ;;  %s2612_s7 = inlined_call_operand.vmem [shape: f32[1,32], index: 7, kind: input, shape index: {}]   ;;  %s2613_s8 = inlined_call_operand.vmem [shape: f32[1,32], index: 8, kind: input, shape index: {}]   ;;  %s2614_s9 = inlined_call_operand.vmem [shape: f32[32,2], index: 9, kind: input, shape index: {}]   ;;  %s2615_s10 = inlined_call_operand.vmem [shape: f32[1,2], index: 10, kind: input, shape index: {}]   ;;  %s2616_s11 = inlined_call_operand.hbm [shape: f32[2,2], index: 11, kind: output, shape index: {}]  }
   0x1   :  { %17 = vsyncpa [#allocation6], 0 }
   0x2   :  { %18 = vsyncpa [#allocation4], 0  ;;  %s2117_s17 = smov [#allocation5]  }
   0x3   :  { %s36_s18 = sshll.u32 %s2117_s17, 4  ;;  %s37_s18 = int_to_ptr.vmem [resolvable:$true] %s36_s18 }
   0x4   :  { %s2039_s19 = scalar_lea.vmem %s37_s18, 64  ;;  %p2044_p1 = scmp.lt.s32.totalorder %s37_s18, %s37_s18 }
   0x5   :  { %p2040_p0 = scmp.ne.s32.totalorder %s37_s18, %s2039_s19  ;;  %p2045_p2 = scmp.lt.s32.totalorder %s2039_s19, %s2039_s19 }
   0x7   :  { %p2046_p3 = por %p2045_p2, %p2044_p1 }
   0x9   :  { %p2047_p4 = pnand %p2046_p3, %p2040_p0 }
   0xb   :  { %2050 = shalt.err (!%p2047_p4)
}
   0xc   :  { %s2118_s20 = smov 32   ;;  %s2119_s21 = smov 2  }
   0xd   :  { %42 = dma.hbm_to_vmem [thread:$0]  %s2606_s1, 64, %s37_s18, [#allocation6], %s2118_s20, %s2118_s20, %s2119_s21  }
   0xe   :  { %s2120_s24 = smov [#allocation2]  }
   0xf   :  { %s24_s25 = sshll.u32 %s2120_s24, 4  ;;  %s25_s25 = int_to_ptr.vmem [resolvable:$true] %s24_s25 }
  0x10   :  { %s2059_s26 = scalar_lea.vmem %s25_s25, 256  ;;  %p2064_p6 = scmp.lt.s32.totalorder %s25_s25, %s25_s25 }
  0x11   :  { %p2060_p5 = scmp.ne.s32.totalorder %s25_s25, %s2059_s26  ;;  %p2065_p7 = scmp.lt.s32.totalorder %s2059_s26, %s2059_s26 }
  0x13   :  { %p2066_p8 = por %p2065_p7, %p2064_p6 }
  0x15   :  { %p2067_p9 = pnand %p2066_p8, %p2060_p5 }
  0x17   :  { %2070 = shalt.err (!%p2067_p9)
}
  0x18   :  { %s2121_s27 = smov 128   ;;  %s2122_s28 = smov 8  }
  0x19   :  { %30 = dma.hbm_to_vmem [thread:$0]  %s2605_s0, 256, %s25_s25, [#allocation3], %s2121_s27, %s2121_s27, %s2122_s28  }
  0x1a   :  { %s2123_s12 = smov [#allocation7]  }
  0x1b   :  { %s50_s13 = sshll.u32 %s2123_s12, 4  ;;  %s51_s13 = int_to_ptr.vmem [resolvable:$true] %s50_s13 }
  0x1c   :  { %s2079_s1 = scalar_lea.vmem %s51_s13, 256  ;;  %p2084_p11 = scmp.lt.s32.totalorder %s51_s13, %s51_s13 }
  0x1d   :  { %p2080_p10 = scmp.ne.s32.totalorder %s51_s13, %s2079_s1  ;;  %p2085_p12 = scmp.lt.s32.totalorder %s2079_s1, %s2079_s1 }
  0x1f   :  { %p2086_p13 = por %p2085_p12, %p2084_p11 }
  0x21   :  { %p2087_p0 = pnand %p2086_p13, %p2080_p10 }
  0x23   :  { %2090 = shalt.err (!%p2087_p0)
}
  0x24   :  { %s2124_s14 = smov 64   ;;  %s2125_s15 = smov 4  }
  0x25   :  { %56 = dma.hbm_to_vmem [thread:$0]  %s2608_s3, 256, %s51_s13, [#allocation6], %s2124_s14, %s2124_s14, %s2125_s15  }
  0x26   :  { %2111 = dma.done.wait [#allocation3], 256  }
  0x27   :  { %2112 = vsyncadd [#allocation3], 4294967040 }
  0x28   :  { %2113 = dma.done.wait [#allocation6], 320  }
  0x29   :  { %2114 = vsyncadd [#allocation6], 4294966976  ;;  %v2126_v0 = vmov 0.0   ;;  %vm2127_vm0 = vmmov 0   ;;  %v2209_v1 = vld [vmem:[#allocation7 + $0x8] sm:$0xff]   ;;  %v2215_v3 = vld [vmem:[#allocation7] sm:$0xff]  }
  0x2a   :  { %1740 = vmatprep.subr.bf16.mxu1 %v2126_v0  ;;  %1734 = vmatprep.subr.bf16.mxu0 %v2126_v0  ;;  %v1925_v2 = vld [vmem:[%s2607_s2] sm:$0xff]   ;;  %v96_v5 = vld [vmem:[#allocation2 + $0x8] sm:$0xff]  ;;  %vm112_vm1 = vcmask 130048   ;;  %v157_v6 = vld [vmem:[#allocation5] sm:$0x3]  ;;  %vm173_vm2 = vcmask 261120  }
  0x2b   :  { %1736 = vmatprep.mubr.msk.bf16.mxu0 %vm2127_vm0, %v2126_v0  ;;  %1744 = vmatprep.mubr.msk.bf16.mxu1 %vm2127_vm0, %v2126_v0  ;;  %v95_v4 = vld [vmem:[#allocation2] sm:$0xff]  ;;  %v160_v9 = vpack.c.bf16 %v157_v6, %v157_v6  ;;  %s2128_s2 = smov 96   ;;  %v2263_v53 = vld [vmem:[%s2610_s5 + $0x18] sm:$0xff]   ;;  %v2269_v54 = vld [vmem:[%s2610_s5 + $0x10] sm:$0xff]   ;;  %vm291_vm3 = vcmask 523264   ;;  %vm1473_vm4 = vcmask 254976  }
  0x2c   :  { %1741 = vmatpush3.bf16.msra.mxu1 %v2209_v1  ;;  %1735 = vmatpush3.bf16.msra.mxu0 %v1925_v2  ;;  %v97_v7 = vpack.c.bf16 %v96_v5, %v95_v4  ;;  %v2221_v8 = vld [vmem:[%s2609_s4] ss:$0 sm:$0xff]  ;;  %v2282_v57 = vld [vmem:[%s2610_s5 + $0x8] sm:$0xff]   ;;  %v159_v60 = vld [vmem:[#allocation5 + $0x2] sm:$0x3]  ;;  %s2129_s0 = smov [#allocation8]  }
  0x2d   :  { %1742 = vmatprep.subr.bf16.mxu1 %v2126_v0  ;;  %1748 = vmatprep.subr.bf16.mxu0 %v2126_v0  ;;  %v2291_v58 = vld [vmem:[%s2610_s5] sm:$0xff]   ;;  %s1607_s3 = sshll.u32 %s2129_s0, 4  ;;  %vm1599_vm5 = vcmask 9216   ;;  %s1608_s3 = int_to_ptr.vmem [resolvable:$true] %s1607_s3 }
  0x2e   :  { %224 = vrot.lane.b32.xlu0 %v2221_v8, %s2128_s2  ;;  %s2091_s18 = scalar_lea.vmem %s1608_s3, 32  ;;  %p2096_p2 = scmp.lt.s32.totalorder %s1608_s3, %s1608_s3 }
  0x2f   :  { %1737 = vmatmul.mubr.msk.bf16.vlgmr.msra.gmra.mxu0 %vm112_vm1, %v97_v7  ;;  %p2092_p1 = scmp.ne.s32.totalorder %s1608_s3, %s2091_s18  ;;  %p2097_p3 = scmp.lt.s32.totalorder %s2091_s18, %s2091_s18 }
  0x30   :  { %1743 = vmatpush3.bf16.msra.mxu1 %v2215_v3  ;;  %1756 = vmatprep.mubr.msk.bf16.mxu0 %vm2127_vm0, %v2126_v0 }
  0x31   :  { %1760 = vmatprep.subr.bf16.mxu1 %v2126_v0  ;;  %1749 = vmatpush3.bf16.msra.mxu0 %v2263_v53  ;;  %p2098_p4 = por %p2097_p3, %p2096_p2 }
  0x32   :  { %1750 = vmatprep.subr.bf16.mxu0 %v2126_v0 }
  0x33   :  { %1745 = vmatmul.mubr.msk.bf16.vlgmr.msra.gmra.mxu1 %vm173_vm2, %v160_v9  ;;  %p2099_p5 = pnand %p2098_p4, %p2092_p1 }
  0x34   :  { %1761 = vmatpush3.bf16.msra.mxu1 %v2209_v1  ;;  %1764 = vmatprep.mubr.msk.bf16.mxu1 %vm2127_vm0, %v2126_v0 }
  0x35   :  { %1762 = vmatprep.subr.bf16.mxu1 %v2126_v0  ;;  %1751 = vmatpush3.bf16.msra.mxu0 %v2269_v54 }
  0x36   :  { %1752 = vmatprep.subr.bf16.mxu0 %v2126_v0 }
  0x38   :  { %1763 = vmatpush3.bf16.msra.mxu1 %v2215_v3 }
  0x39   :  { %1768 = vmatprep.subr.bf16.mxu1 %v2126_v0  ;;  %1753 = vmatpush3.bf16.msra.mxu0 %v2282_v57 }
  0x3a   :  { %1754 = vmatprep.subr.bf16.mxu0 %v2126_v0 }
  0x3d   :  { %1755 = vmatpush3.bf16.msra.mxu0 %v2291_v58 }
  0x3e   :  { %1780 = vmatprep.subr.bf16.mxu0 %v2126_v0 }
  0xa0   :  { %v2237_v11 = vpop.permute.xlu0 %224 }
  0xef   :  { %v150_v10 = vpop.f32.mrf.mxu0 }
  0xf0   :  { %v2245_v20 = vadd.f32 %v2221_v8, %v150_v10 }
  0xf1   :  { %v1738_v12 = vpop.f32.mrf.mxu0 }
  0xf3   :  { %v211_v13 = vpop.f32.mrf.mxu1  ;;  %v2240_v15 = vpop.f32.mrf.mxu0 }
  0xf4   :  { %v227_v14 = vadd.f32 %v2237_v11, %v211_v13  ;;  %v217_v21 = vadd.f32 %v211_v13, %v2245_v20 }
  0xf5   :  { %v1746_v16 = vpop.f32.mrf.mxu1  ;;  %v1739_v17 = vpop.f32.mrf.mxu0 }
  0xf6   :  { %229 = vrot.lane.b32.xlu0 %v227_v14, %s2124_s14  ;;  %v1623_v22 = vmul.f32 -1.442695, %v217_v21  ;;  %v2329_v16 = vld [vmem:[%s2611_s6] ss:$0 sm:$0xff] }
  0xf7   :  { %v214_v18 = vpop.f32.mrf.mxu1 }
  0xf8   :  { %1931 = vpow2.f32 %v1623_v22 }
  0xf9   :  { %v1747_v19 = vpop.f32.mrf.mxu1 }
  0xfa   :  { %246 = vrot.lane.b32.xlu0 %v157_v6, %s2118_s20 }
 0x105   :  { %v1932_v23 = vpop.eup %1931 }
 0x106   :  { %v221_v24 = vadd.f32 1.0, %v1932_v23 }
 0x108   :  { %1933 = vrcp.f32 %v221_v24 }
 0x115   :  { %v1934_v25 = vpop.eup %1933 }
 0x116   :  { %v239_v32 = vsub.f32 1.0, %v1934_v25 }
 0x168   :  { %v230_v26 = vpop.permute.xlu0 %229 }
 0x169   :  { %v232_v27 = vmul.f32 %v1934_v25, %v230_v26 }
 0x16b   :  { %234 = vrot.lane.b32.xlu1 %v232_v27, %s2124_s14 }
 0x16c   :  { %v247_v31 = vpop.permute.xlu0 %246 }
 0x16d   :  { %v249_v34 = vmul.f32 %v1934_v25, %v247_v31 }
 0x1dd   :  { %v235_v28 = vpop.permute.xlu1 %234 }
 0x1de   :  { %v237_v29 = vadd.f32 %v235_v28, %v2245_v20 }
 0x1e0   :  { %1935 = vtanh.f32 %v237_v29 }
 0x1ed   :  { %v1936_v30 = vpop.eup %1935 }
 0x1ee   :  { %241 = vrot.lane.b32.xlu1 %v1936_v30, %s2128_s2 }
 0x260   :  { %v242_v33 = vpop.permute.xlu1 %241 }
 0x261   :  { %v244_v35 = vmul.f32 %v242_v33, %v239_v32 }
 0x263   :  { %v250_v36 = vadd.f32 %v249_v34, %v244_v35 }
 0x265   :  { %v360_v37 = vpack.c.bf16 %v250_v36, %v250_v36  ;;  %v436_v62 = vrot.slane %v250_v36, 6 }
 0x267   :  { %362 = vrot.lane.b32.xlu1 %v360_v37, %s2128_s2 }
 0x2d9   :  { %v363_v38 = vpop.permute.xlu1 %362 }
 0x2da   :  { %1765 = vmatmul.mubr.msk.bf16.vlgmr.msra.gmra.mxu1 %vm173_vm2, %v363_v38 }
 0x2db   :  { %1776 = vmatprep.mubr.msk.bf16.mxu1 %vm2127_vm0, %v2126_v0  ;;  %1769 = vmatpush3.bf16.msra.mxu1 %v2263_v53 }
 0x2dc   :  { %1770 = vmatprep.subr.bf16.mxu1 %v2126_v0 }
 0x2df   :  { %1771 = vmatpush3.bf16.msra.mxu1 %v2269_v54 }
 0x2e0   :  { %1772 = vmatprep.subr.bf16.mxu1 %v2126_v0 }
 0x2e3   :  { %1773 = vmatpush3.bf16.msra.mxu1 %v2282_v57 }
 0x2e4   :  { %1774 = vmatprep.subr.bf16.mxu1 %v2126_v0 }
 0x2e7   :  { %1775 = vmatpush3.bf16.msra.mxu1 %v2291_v58 }
 0x2e8   :  { %1800 = vmatprep.subr.bf16.mxu1 %v2126_v0 }
 0x39a   :  { %v401_v39 = vpop.f32.mrf.mxu1 }
 0x39b   :  { %v417_v40 = vadd.f32 %v401_v39, %v2237_v11  ;;  %v408_v45 = vrot.slane %v401_v39, 6 }
 0x39c   :  { %v1766_v41 = vpop.f32.mrf.mxu1 }
 0x39d   :  { %v419_v42 = vrot.slane %v417_v40, 6  ;;  %v410_v46 = vadd.f32 %v408_v45, %v2245_v20 }
 0x39e   :  { %v404_v43 = vpop.f32.mrf.mxu1 }
 0x39f   :  { %420 = vrot.lane.b32.xlu0 %v419_v42, %s2124_s14  ;;  %v1632_v47 = vmul.f32 -1.442695, %v410_v46 }
 0x3a0   :  { %v1767_v44 = vpop.f32.mrf.mxu1 }
 0x3a1   :  { %1937 = vpow2.f32 %v1632_v47 }
 0x3ae   :  { %v1938_v48 = vpop.eup %1937 }
 0x3af   :  { %v414_v49 = vadd.f32 1.0, %v1938_v48 }
 0x3b1   :  { %1939 = vrcp.f32 %v414_v49 }
 0x3be   :  { %v1940_v50 = vpop.eup %1939 }
 0x3bf   :  { %v430_v61 = vsub.f32 1.0, %v1940_v50  ;;  %v438_v2 = vmul.f32 %v1940_v50, %v436_v62 }
 0x411   :  { %v421_v51 = vpop.permute.xlu0 %420 }
 0x412   :  { %v423_v52 = vmul.f32 %v1940_v50, %v421_v51 }
 0x414   :  { %425 = vrot.lane.b32.xlu1 %v423_v52, %s2124_s14 }
 0x418   :  { %252 = vrot.lane.b32.xlu1 %v250_v36, %s2128_s2 }
 0x486   :  { %v426_v55 = vpop.permute.xlu1 %425 }
 0x487   :  { %v428_v56 = vadd.f32 %v426_v55, %v2245_v20 }
 0x489   :  { %1941 = vtanh.f32 %v428_v56 }
 0x48a   :  { %v253_v6 = vpop.permute.xlu1 %252 }
 0x496   :  { %v1942_v59 = vpop.eup %1941 }
 0x497   :  { %432 = vrot.lane.b32.xlu0 %v1942_v59, %s2128_s2 }
 0x49b   :  { %256 = vrot.lane.b32.xlu0 %v159_v60, %s2118_s20 }
 0x509   :  { %v433_v63 = vpop.permute.xlu0 %432 }
 0x50a   :  { %v435_v4 = vmul.f32 %v433_v63, %v430_v61 }
 0x50c   :  { %v2299_v5 = vadd.f32 %v438_v2, %v435_v4 }
 0x50d   :  { %v2301_v7 = vpop.permute.xlu0 %256 }
 0x50e   :  { %v259_v9 = vsel %vm173_vm2, %v253_v6, %v2301_v7  ;;  %v519_v10 = vpack.c.bf16 %v2299_v5, %v2299_v5  ;;  %v596_v2 = vrot.slane %v2299_v5, 6 }
 0x50f   :  { %v260_v12 = vpack.c.bf16 %v259_v9, %v259_v9 }
 0x510   :  { %v521_v13 = vrot.slane %v519_v10, 1 }
 0x511   :  { %1757 = vmatmul.mubr.msk.bf16.vlgmr.msra.gmra.mxu0 %vm291_vm3, %v260_v12 }
 0x512   :  { %522 = vrot.lane.b32.xlu1 %v521_v13, %s2128_s2  ;;  %1781 = vmatpush3.bf16.msra.mxu0 %v2209_v1 }
 0x513   :  { %1782 = vmatprep.subr.bf16.mxu0 %v2126_v0  ;;  %1784 = vmatprep.mubr.msk.bf16.mxu0 %vm2127_vm0, %v2126_v0 }
 0x516   :  { %1783 = vmatpush3.bf16.msra.mxu0 %v2215_v3 }
 0x517   :  { %1788 = vmatprep.subr.bf16.mxu0 %v2126_v0 }
 0x584   :  { %v523_v14 = vpop.permute.xlu1 %522 }
 0x585   :  { %1785 = vmatmul.mubr.msk.bf16.vlgmr.msra.gmra.mxu0 %vm173_vm2, %v523_v14 }
 0x586   :  { %1789 = vmatpush3.bf16.msra.mxu0 %v2263_v53  ;;  %1796 = vmatprep.mubr.msk.bf16.mxu0 %vm2127_vm0, %v2126_v0 }
 0x587   :  { %1790 = vmatprep.subr.bf16.mxu0 %v2126_v0 }
 0x58a   :  { %1791 = vmatpush3.bf16.msra.mxu0 %v2269_v54 }
 0x58b   :  { %1792 = vmatprep.subr.bf16.mxu0 %v2126_v0 }
 0x58e   :  { %1793 = vmatpush3.bf16.msra.mxu0 %v2282_v57 }
 0x58f   :  { %1794 = vmatprep.subr.bf16.mxu0 %v2126_v0 }
 0x592   :  { %1795 = vmatpush3.bf16.msra.mxu0 %v2291_v58 }
 0x593   :  { %1820 = vmatprep.subr.bf16.mxu0 %v2126_v0 }
 0x5d1   :  { %v329_v17 = vpop.f32.mrf.mxu0 }
 0x5d2   :  { %v330_v18 = vadd.f32 %v2329_v16, %v329_v17 }
 0x5d3   :  { %v1758_v19 = vpop.f32.mrf.mxu0 }
 0x5d4   :  { %342 = vrot.lane.b32.xlu0 %v330_v18, %s2118_s20  ;;  %v1630_v23 = vmul.f32 -1.442695, %v330_v18 }
 0x5d5   :  { %v332_v21 = vpop.f32.mrf.mxu0 }
 0x5d6   :  { %1943 = vpow2.f32 %v1630_v23 }
 0x5d7   :  { %v1759_v22 = vpop.f32.mrf.mxu0 }
 0x5e3   :  { %v1944_v24 = vpop.eup %1943 }
 0x5e4   :  { %v338_v25 = vadd.f32 1.0, %v1944_v24 }
 0x5e6   :  { %1945 = vrcp.f32 %v338_v25 }
 0x5f3   :  { %v1946_v27 = vpop.eup %1945 }
 0x5f4   :  { %v352_v48 = vsub.f32 1.0, %v1946_v27  ;;  %v358_v50 = vmul.f32 %v1946_v27, %v2301_v7 }
 0x645   :  { %v561_v26 = vpop.f32.mrf.mxu0 }
 0x646   :  { %v577_v28 = vadd.f32 %v561_v26, %v2237_v11  ;;  %v343_v29 = vpop.permute.xlu0 %342  ;;  %v568_v35 = vrot.slane %v561_v26, 4 }
 0x647   :  { %v345_v30 = vmul.f32 %v1946_v27, %v343_v29  ;;  %v1786_v31 = vpop.f32.mrf.mxu0 }
 0x648   :  { %v579_v32 = vrot.slane %v577_v28, 4  ;;  %v570_v36 = vadd.f32 %v568_v35, %v2245_v20 }
 0x649   :  { %347 = vrot.lane.b32.xlu0 %v345_v30, %s2124_s14  ;;  %v564_v33 = vpop.f32.mrf.mxu0 }
 0x64a   :  { %580 = vrot.lane.b32.xlu1 %v579_v32, %s2124_s14  ;;  %v1636_v37 = vmul.f32 -1.442695, %v570_v36 }
 0x64b   :  { %v1787_v34 = vpop.f32.mrf.mxu0 }
 0x64c   :  { %1947 = vpow2.f32 %v1636_v37 }
 0x659   :  { %v1948_v38 = vpop.eup %1947 }
 0x65a   :  { %v574_v39 = vadd.f32 1.0, %v1948_v38 }
 0x65c   :  { %1949 = vrcp.f32 %v574_v39 }
 0x669   :  { %v1950_v41 = vpop.eup %1949 }
 0x66a   :  { %v590_v63 = vsub.f32 1.0, %v1950_v41  ;;  %v598_v6 = vmul.f32 %v1950_v41, %v596_v2 }
 0x6bb   :  { %v348_v40 = vpop.permute.xlu0 %347 }
 0x6bc   :  { %v350_v42 = vadd.f32 %v348_v40, %v330_v18  ;;  %v581_v43 = vpop.permute.xlu1 %580 }
 0x6bd   :  { %v583_v44 = vmul.f32 %v1950_v41, %v581_v43 }
 0x6be   :  { %1951 = vtanh.f32 %v350_v42 }
 0x6bf   :  { %585 = vrot.lane.b32.xlu1 %v583_v44, %s2124_s14 }
 0x6c3   :  { %441 = vrot.lane.b32.xlu1 %v2299_v5, %s2128_s2 }
 0x6cb   :  { %v1952_v45 = vpop.eup %1951 }
 0x6cc   :  { %354 = vrot.lane.b32.xlu0 %v1952_v45, %s2128_s2 }
 0x731   :  { %v586_v46 = vpop.permute.xlu1 %585 }
 0x732   :  { %v588_v47 = vadd.f32 %v586_v46, %v2245_v20 }
 0x734   :  { %1953 = vtanh.f32 %v588_v47 }
 0x735   :  { %v442_v59 = vpop.permute.xlu1 %441 }
 0x73e   :  { %v355_v49 = vpop.permute.xlu0 %354 }
 0x73f   :  { %v357_v51 = vmul.f32 %v355_v49, %v352_v48 }
 0x741   :  { %v1954_v52 = vpop.eup %1953  ;;  %v2343_v55 = vadd.f32 %v358_v50, %v357_v51 }
 0x742   :  { %592 = vrot.lane.b32.xlu0 %v1954_v52, %s2128_s2 }
 0x743   :  { %v445_v56 = vrot.slane %v2343_v55, 6 }
 0x745   :  { %v447_v60 = vsel %vm173_vm2, %v442_v59, %v445_v56 }
 0x746   :  { %v448_v61 = vpack.c.bf16 %v447_v60, %v447_v60 }
 0x748   :  { %v450_v62 = vrot.slane %v448_v61, 1 }
 0x74a   :  { %1777 = vmatmul.mubr.msk.bf16.vlgmr.msra.gmra.mxu1 %vm291_vm3, %v450_v62 }
 0x74b   :  { %1801 = vmatpush3.bf16.msra.mxu1 %v2209_v1  ;;  %1804 = vmatprep.mubr.msk.bf16.mxu1 %vm2127_vm0, %v2126_v0 }
 0x74c   :  { %1802 = vmatprep.subr.bf16.mxu1 %v2126_v0 }
 0x74f   :  { %1803 = vmatpush3.bf16.msra.mxu1 %v2215_v3 }
 0x750   :  { %1808 = vmatprep.subr.bf16.mxu1 %v2126_v0 }
 0x7b4   :  { %v593_v4 = vpop.permute.xlu0 %592 }
 0x7b5   :  { %v595_v7 = vmul.f32 %v593_v4, %v590_v63 }
 0x7b7   :  { %v2356_v9 = vadd.f32 %v598_v6, %v595_v7 }
 0x7b9   :  { %v679_v10 = vpack.c.bf16 %v2356_v9, %v2356_v9  ;;  %v756_v7 = vrot.slane %v2356_v9, 6 }
 0x7bb   :  { %v681_v12 = vrot.slane %v679_v10, 2 }
 0x7bd   :  { %682 = vrot.lane.b32.xlu1 %v681_v12, %s2128_s2 }
 0x80a   :  { %v488_v13 = vpop.f32.mrf.mxu1 }
 0x80b   :  { %v489_v14 = vadd.f32 %v2329_v16, %v488_v13 }
 0x80c   :  { %v1778_v17 = vpop.f32.mrf.mxu1 }
 0x80d   :  { %501 = vrot.lane.b32.xlu0 %v489_v14, %s2118_s20  ;;  %v1634_v21 = vmul.f32 -1.442695, %v489_v14 }
 0x80e   :  { %v491_v18 = vpop.f32.mrf.mxu1 }
 0x80f   :  { %1955 = vpow2.f32 %v1634_v21 }
 0x810   :  { %v1779_v19 = vpop.f32.mrf.mxu1 }
 0x81c   :  { %v1956_v22 = vpop.eup %1955 }
 0x81d   :  { %v497_v23 = vadd.f32 1.0, %v1956_v22 }
 0x81f   :  { %1957 = vrcp.f32 %v497_v23 }
 0x82c   :  { %v1958_v24 = vpop.eup %1957 }
 0x82d   :  { %v511_v44 = vsub.f32 1.0, %v1958_v24  ;;  %v517_v46 = vmul.f32 %v1958_v24, %v2343_v55 }
 0x82f   :  { %v683_v5 = vpop.permute.xlu1 %682 }
 0x830   :  { %1805 = vmatmul.mubr.msk.bf16.vlgmr.msra.gmra.mxu1 %vm173_vm2, %v683_v5 }
 0x831   :  { %1809 = vmatpush3.bf16.msra.mxu1 %v2263_v53  ;;  %1816 = vmatprep.mubr.msk.bf16.mxu1 %vm2127_vm0, %v2126_v0 }
 0x832   :  { %1810 = vmatprep.subr.bf16.mxu1 %v2126_v0 }
 0x835   :  { %1811 = vmatpush3.bf16.msra.mxu1 %v2269_v54 }
 0x836   :  { %1812 = vmatprep.subr.bf16.mxu1 %v2126_v0 }
 0x839   :  { %1813 = vmatpush3.bf16.msra.mxu1 %v2282_v57 }
 0x83a   :  { %1814 = vmatprep.subr.bf16.mxu1 %v2126_v0 }
 0x83d   :  { %1815 = vmatpush3.bf16.msra.mxu1 %v2291_v58 }
 0x83e   :  { %1840 = vmatprep.subr.bf16.mxu1 %v2126_v0 }
 0x87f   :  { %v502_v25 = vpop.permute.xlu0 %501 }
 0x880   :  { %v504_v26 = vmul.f32 %v1958_v24, %v502_v25 }
 0x882   :  { %506 = vrot.lane.b32.xlu1 %v504_v26, %s2124_s14 }
 0x8f0   :  { %v721_v27 = vpop.f32.mrf.mxu1 }
 0x8f1   :  { %v737_v28 = vadd.f32 %v721_v27, %v2237_v11  ;;  %v728_v36 = vrot.slane %v721_v27, 2 }
 0x8f2   :  { %v1806_v29 = vpop.f32.mrf.mxu1 }
 0x8f3   :  { %v739_v30 = vrot.slane %v737_v28, 2  ;;  %v730_v37 = vadd.f32 %v728_v36, %v2245_v20 }
 0x8f4   :  { %v507_v31 = vpop.permute.xlu1 %506  ;;  %v724_v32 = vpop.f32.mrf.mxu1 }
 0x8f5   :  { %v509_v33 = vadd.f32 %v507_v31, %v489_v14  ;;  %740 = vrot.lane.b32.xlu0 %v739_v30, %s2124_s14  ;;  %v1640_v38 = vmul.f32 -1.442695, %v730_v37 }
 0x8f6   :  { %v1807_v34 = vpop.f32.mrf.mxu1 }
 0x8f7   :  { %1959 = vtanh.f32 %v509_v33 }
 0x8f8   :  { %1961 = vpow2.f32 %v1640_v38 }
 0x8f9   :  { %601 = vrot.lane.b32.xlu0 %v2356_v9, %s2128_s2 }
 0x904   :  { %v1960_v35 = vpop.eup %1959 }
 0x905   :  { %513 = vrot.lane.b32.xlu1 %v1960_v35, %s2128_s2  ;;  %v1962_v39 = vpop.eup %1961 }
 0x906   :  { %v734_v40 = vadd.f32 1.0, %v1962_v39 }
 0x908   :  { %1963 = vrcp.f32 %v734_v40 }
 0x915   :  { %v1964_v41 = vpop.eup %1963 }
 0x916   :  { %v750_v6 = vsub.f32 1.0, %v1964_v41  ;;  %v758_v12 = vmul.f32 %v1964_v41, %v756_v7 }
 0x967   :  { %v741_v42 = vpop.permute.xlu0 %740 }
 0x968   :  { %v743_v43 = vmul.f32 %v1964_v41, %v741_v42  ;;  %v2435_v42 = vadd.f32 %v2221_v8, %v2240_v15 }
 0x96a   :  { %745 = vrot.lane.b32.xlu1 %v743_v43, %s2124_s14 }
 0x96b   :  { %v602_v50 = vpop.permute.xlu0 %601 }
 0x977   :  { %v514_v45 = vpop.permute.xlu1 %513 }
 0x978   :  { %v516_v47 = vmul.f32 %v514_v45, %v511_v44 }
 0x97a   :  { %v2383_v48 = vadd.f32 %v517_v46, %v516_v47 }
 0x97c   :  { %v605_v49 = vrot.slane %v2383_v48, 4 }
 0x97e   :  { %v607_v51 = vsel %vm173_vm2, %v602_v50, %v605_v49 }
 0x97f   :  { %v608_v52 = vpack.c.bf16 %v607_v51, %v607_v51 }
 0x981   :  { %v610_v56 = vrot.slane %v608_v52, 2 }
 0x983   :  { %1797 = vmatmul.mubr.msk.bf16.vlgmr.msra.gmra.mxu0 %vm291_vm3, %v610_v56 }
 0x984   :  { %1821 = vmatpush3.bf16.msra.mxu0 %v2209_v1  ;;  %1824 = vmatprep.mubr.msk.bf16.mxu0 %vm2127_vm0, %v2126_v0 }
 0x985   :  { %1822 = vmatprep.subr.bf16.mxu0 %v2126_v0 }
 0x988   :  { %1823 = vmatpush3.bf16.msra.mxu0 %v2215_v3 }
 0x989   :  { %1828 = vmatprep.subr.bf16.mxu0 %v2126_v0 }
 0x9dc   :  { %v746_v55 = vpop.permute.xlu1 %745 }
 0x9dd   :  { %v748_v59 = vadd.f32 %v746_v55, %v2245_v20 }
 0x9df   :  { %1965 = vtanh.f32 %v748_v59 }
 0x9ec   :  { %v1966_v60 = vpop.eup %1965 }
 0x9ed   :  { %752 = vrot.lane.b32.xlu0 %v1966_v60, %s2128_s2 }
 0xa43   :  { %v648_v61 = vpop.f32.mrf.mxu0 }
 0xa44   :  { %v649_v62 = vadd.f32 %v2329_v16, %v648_v61 }
 0xa45   :  { %v1798_v63 = vpop.f32.mrf.mxu0 }
 0xa46   :  { %661 = vrot.lane.b32.xlu0 %v649_v62, %s2118_s20  ;;  %v1638_v18 = vmul.f32 -1.442695, %v649_v62 }
 0xa47   :  { %v651_v2 = vpop.f32.mrf.mxu0 }
 0xa48   :  { %1967 = vpow2.f32 %v1638_v18 }
 0xa49   :  { %v1799_v4 = vpop.f32.mrf.mxu0 }
 0xa55   :  { %v1968_v19 = vpop.eup %1967 }
 0xa56   :  { %v657_v5 = vadd.f32 1.0, %v1968_v19 }
 0xa58   :  { %1969 = vrcp.f32 %v657_v5 }
 0xa5f   :  { %v753_v10 = vpop.permute.xlu0 %752 }
 0xa60   :  { %v755_v13 = vmul.f32 %v753_v10, %v750_v6 }
 0xa62   :  { %v2399_v14 = vadd.f32 %v758_v12, %v755_v13 }
 0xa64   :  { %v839_v20 = vpack.c.bf16 %v2399_v14, %v2399_v14  ;;  %v912_v2 = vrot.slane %v2399_v14, 6 }
 0xa65   :  { %v1970_v21 = vpop.eup %1969 }
 0xa66   :  { %v841_v17 = vrot.slane %v839_v20, 3  ;;  %v671_v32 = vsub.f32 1.0, %v1970_v21  ;;  %v677_v34 = vmul.f32 %v1970_v21, %v2383_v48 }
 0xa68   :  { %842 = vrot.lane.b32.xlu1 %v841_v17, %s2128_s2 }
 0xab8   :  { %v662_v22 = vpop.permute.xlu0 %661 }
 0xab9   :  { %v664_v23 = vmul.f32 %v1970_v21, %v662_v22 }
 0xabb   :  { %666 = vrot.lane.b32.xlu1 %v664_v23, %s2124_s14 }
 0xabf   :  { %761 = vrot.lane.b32.xlu1 %v2399_v14, %s2128_s2 }
 0xada   :  { %v843_v9 = vpop.permute.xlu1 %842 }
 0xadb   :  { %1825 = vmatmul.mubr.msk.bf16.vlgmr.msra.gmra.mxu0 %vm173_vm2, %v843_v9 }
 0xadc   :  { %1829 = vmatpush3.bf16.msra.mxu0 %v2263_v53  ;;  %1836 = vmatprep.mubr.msk.bf16.mxu0 %vm2127_vm0, %v2126_v0 }
 0xadd   :  { %1830 = vmatprep.subr.bf16.mxu0 %v2126_v0 }
 0xae0   :  { %1831 = vmatpush3.bf16.msra.mxu0 %v2269_v54 }
 0xae1   :  { %1832 = vmatprep.subr.bf16.mxu0 %v2126_v0 }
 0xae4   :  { %1833 = vmatpush3.bf16.msra.mxu0 %v2282_v57 }
 0xae5   :  { %1834 = vmatprep.subr.bf16.mxu0 %v2126_v0 }
 0xae8   :  { %1835 = vmatpush3.bf16.msra.mxu0 %v2291_v58 }
 0xae9   :  { %1860 = vmatprep.subr.bf16.mxu0 %v2126_v0 }
 0xb2d   :  { %v667_v24 = vpop.permute.xlu1 %666 }
 0xb2e   :  { %v669_v25 = vadd.f32 %v667_v24, %v649_v62 }
 0xb30   :  { %1971 = vtanh.f32 %v669_v25 }
 0xb31   :  { %v762_v38 = vpop.permute.xlu1 %761 }
 0xb3d   :  { %v1972_v26 = vpop.eup %1971 }
 0xb3e   :  { %673 = vrot.lane.b32.xlu0 %v1972_v26, %s2128_s2 }
 0xb9b   :  { %v881_v27 = vpop.f32.mrf.mxu0 }
 0xb9c   :  { %v894_v28 = vadd.f32 %v881_v27, %v2237_v11  ;;  %v887_v43 = vadd.f32 %v881_v27, %v2435_v42 }
 0xb9d   :  { %v1826_v29 = vpop.f32.mrf.mxu0 }
 0xb9e   :  { %896 = vrot.lane.b32.xlu0 %v894_v28, %s2124_s14  ;;  %v1644_v44 = vmul.f32 -1.442695, %v887_v43 }
 0xb9f   :  { %v884_v30 = vpop.f32.mrf.mxu0 }
 0xba0   :  { %1973 = vpow2.f32 %v1644_v44 }
 0xba1   :  { %v1827_v31 = vpop.f32.mrf.mxu0 }
 0xbad   :  { %v1974_v45 = vpop.eup %1973 }
 0xbae   :  { %v891_v46 = vadd.f32 1.0, %v1974_v45 }
 0xbb0   :  { %v674_v33 = vpop.permute.xlu0 %673  ;;  %1975 = vrcp.f32 %v891_v46 }
 0xbb1   :  { %v676_v35 = vmul.f32 %v674_v33, %v671_v32 }
 0xbb3   :  { %v2422_v36 = vadd.f32 %v677_v34, %v676_v35 }
 0xbb5   :  { %v765_v37 = vrot.slane %v2422_v36, 2 }
 0xbb7   :  { %v767_v39 = vsel %vm173_vm2, %v762_v38, %v765_v37 }
 0xbb8   :  { %v768_v40 = vpack.c.bf16 %v767_v39, %v767_v39 }
 0xbba   :  { %v770_v41 = vrot.slane %v768_v40, 3 }
 0xbbc   :  { %1817 = vmatmul.mubr.msk.bf16.vlgmr.msra.gmra.mxu1 %vm291_vm3, %v770_v41 }
 0xbbd   :  { %1841 = vmatpush3.bf16.msra.mxu1 %v2209_v1  ;;  %1844 = vmatprep.mubr.msk.bf16.mxu1 %vm2127_vm0, %v2126_v0  ;;  %v1976_v47 = vpop.eup %1975 }
 0xbbe   :  { %1842 = vmatprep.subr.bf16.mxu1 %v2126_v0  ;;  %v906_v63 = vsub.f32 1.0, %v1976_v47  ;;  %v914_v6 = vmul.f32 %v1976_v47, %v912_v2 }
 0xbc1   :  { %1843 = vmatpush3.bf16.msra.mxu1 %v2215_v3 }
 0xbc2   :  { %1848 = vmatprep.subr.bf16.mxu1 %v2126_v0 }
 0xc10   :  { %v897_v48 = vpop.permute.xlu0 %896 }
 0xc11   :  { %v899_v49 = vmul.f32 %v1976_v47, %v897_v48 }
 0xc13   :  { %901 = vrot.lane.b32.xlu1 %v899_v49, %s2124_s14 }
 0xc7c   :  { %v808_v50 = vpop.f32.mrf.mxu1 }
 0xc7d   :  { %v809_v59 = vadd.f32 %v2329_v16, %v808_v50 }
 0xc7e   :  { %v1818_v51 = vpop.f32.mrf.mxu1 }
 0xc7f   :  { %v1642_v60 = vmul.f32 -1.442695, %v809_v59 }
 0xc80   :  { %v811_v52 = vpop.f32.mrf.mxu1 }
 0xc82   :  { %v1819_v56 = vpop.f32.mrf.mxu1 }
 0xc85   :  { %v902_v55 = vpop.permute.xlu1 %901 }
 0xc86   :  { %v904_v8 = vadd.f32 %v902_v55, %v2435_v42 }
 0xc88   :  { %1977 = vtanh.f32 %v904_v8 }
 0xc89   :  { %1979 = vpow2.f32 %v1642_v60 }
 0xc95   :  { %v1978_v15 = vpop.eup %1977 }
 0xc96   :  { %908 = vrot.lane.b32.xlu0 %v1978_v15, %s2128_s2  ;;  %v1980_v61 = vpop.eup %1979 }
 0xc97   :  { %v817_v62 = vadd.f32 1.0, %v1980_v61 }
 0xc99   :  { %1981 = vrcp.f32 %v817_v62 }
 0xc9a   :  { %821 = vrot.lane.b32.xlu0 %v809_v59, %s2118_s20 }
 0xca6   :  { %v1982_v20 = vpop.eup %1981 }
 0xca7   :  { %v831_v21 = vsub.f32 1.0, %v1982_v20  ;;  %v837_v23 = vmul.f32 %v1982_v20, %v2422_v36 }
 0xd08   :  { %v909_v4 = vpop.permute.xlu0 %908 }
 0xd09   :  { %v911_v7 = vmul.f32 %v909_v4, %v906_v63 }
 0xd0b   :  { %v2444_v10 = vadd.f32 %v914_v6, %v911_v7 }
 0xd0c   :  { %v822_v13 = vpop.permute.xlu0 %821 }
 0xd0d   :  { %v990_v12 = vpack.c.bf16 %v2444_v10, %v2444_v10  ;;  %v824_v17 = vmul.f32 %v1982_v20, %v822_v13  ;;  %v1066_v60 = vrot.slane %v2444_v10, 6 }
 0xd0f   :  { %992 = vrot.lane.b32.xlu1 %v990_v12, %s2128_s2 }
 0xd13   :  { %826 = vrot.lane.b32.xlu1 %v824_v17, %s2124_s14 }
 0xd17   :  { %917 = vrot.lane.b32.xlu1 %v2444_v10, %s2128_s2 }
 0xd81   :  { %v993_v18 = vpop.permute.xlu1 %992 }
 0xd82   :  { %1845 = vmatmul.mubr.msk.bf16.vlgmr.msra.gmra.mxu1 %vm173_vm2, %v993_v18 }
 0xd83   :  { %1849 = vmatpush3.bf16.msra.mxu1 %v2263_v53  ;;  %1856 = vmatprep.mubr.msk.bf16.mxu1 %vm2127_vm0, %v2126_v0 }
 0xd84   :  { %1850 = vmatprep.subr.bf16.mxu1 %v2126_v0 }
 0xd85   :  { %v827_v14 = vpop.permute.xlu1 %826 }
 0xd86   :  { %v829_v19 = vadd.f32 %v827_v14, %v809_v59 }
 0xd87   :  { %1851 = vmatpush3.bf16.msra.mxu1 %v2269_v54 }
 0xd88   :  { %1983 = vtanh.f32 %v829_v19  ;;  %1852 = vmatprep.subr.bf16.mxu1 %v2126_v0 }
 0xd89   :  { %v918_v25 = vpop.permute.xlu1 %917 }
 0xd8b   :  { %1853 = vmatpush3.bf16.msra.mxu1 %v2282_v57 }
 0xd8c   :  { %1854 = vmatprep.subr.bf16.mxu1 %v2126_v0 }
 0xd8f   :  { %1855 = vmatpush3.bf16.msra.mxu1 %v2291_v58 }
 0xd90   :  { %1880 = vmatprep.subr.bf16.mxu1 %v2126_v0 }
 0xd95   :  { %v1984_v5 = vpop.eup %1983 }
 0xd96   :  { %833 = vrot.lane.b32.xlu0 %v1984_v5, %s2128_s2 }
 0xe08   :  { %v834_v22 = vpop.permute.xlu0 %833 }
 0xe09   :  { %v836_v9 = vmul.f32 %v834_v22, %v831_v21 }
 0xe0b   :  { %v2465_v24 = vadd.f32 %v837_v23, %v836_v9 }
 0xe0d   :  { %v920_v26 = vsel %vm173_vm2, %v918_v25, %v2465_v24 }
 0xe0e   :  { %v921_v27 = vpack.c.bf16 %v920_v26, %v920_v26 }
 0xe10   :  { %1837 = vmatmul.mubr.msk.bf16.vlgmr.msra.gmra.mxu0 %vm291_vm3, %v921_v27 }
 0xe11   :  { %1861 = vmatpush3.bf16.msra.mxu0 %v2209_v1  ;;  %1864 = vmatprep.mubr.msk.bf16.mxu0 %vm2127_vm0, %v2126_v0 }
 0xe12   :  { %1862 = vmatprep.subr.bf16.mxu0 %v2126_v0 }
 0xe15   :  { %1863 = vmatpush3.bf16.msra.mxu0 %v2215_v3 }
 0xe16   :  { %1868 = vmatprep.subr.bf16.mxu0 %v2126_v0 }
 0xe42   :  { %v1031_v28 = vpop.f32.mrf.mxu1 }
 0xe43   :  { %v1047_v29 = vadd.f32 %v1031_v28, %v2237_v11  ;;  %v1038_v34 = vrot.slane %v1031_v28, 6 }
 0xe44   :  { %v1846_v30 = vpop.f32.mrf.mxu1 }
 0xe45   :  { %v1049_v31 = vrot.slane %v1047_v29, 6  ;;  %v1040_v35 = vadd.f32 %v1038_v34, %v2435_v42 }
 0xe46   :  { %v1034_v32 = vpop.f32.mrf.mxu1 }
 0xe47   :  { %1050 = vrot.lane.b32.xlu0 %v1049_v31, %s2124_s14  ;;  %v1648_v36 = vmul.f32 -1.442695, %v1040_v35 }
 0xe48   :  { %v1847_v33 = vpop.f32.mrf.mxu1 }
 0xe49   :  { %1985 = vpow2.f32 %v1648_v36 }
 0xe56   :  { %v1986_v37 = vpop.eup %1985 }
 0xe57   :  { %v1044_v38 = vadd.f32 1.0, %v1986_v37 }
 0xe59   :  { %1987 = vrcp.f32 %v1044_v38 }
 0xe66   :  { %v1988_v39 = vpop.eup %1987 }
 0xe67   :  { %v1060_v59 = vsub.f32 1.0, %v1988_v39  ;;  %v1068_v62 = vmul.f32 %v1988_v39, %v1066_v60 }
 0xeb9   :  { %v1051_v40 = vpop.permute.xlu0 %1050 }
 0xeba   :  { %v1053_v41 = vmul.f32 %v1988_v39, %v1051_v40 }
 0xebc   :  { %1055 = vrot.lane.b32.xlu1 %v1053_v41, %s2124_s14 }
 0xed0   :  { %v959_v43 = vpop.f32.mrf.mxu0 }
 0xed1   :  { %v960_v44 = vadd.f32 %v2329_v16, %v959_v43 }
 0xed2   :  { %v1838_v45 = vpop.f32.mrf.mxu0 }
 0xed3   :  { %972 = vrot.lane.b32.xlu1 %v960_v44, %s2118_s20  ;;  %v1646_v48 = vmul.f32 -1.442695, %v960_v44 }
 0xed4   :  { %v962_v46 = vpop.f32.mrf.mxu0 }
 0xed5   :  { %1989 = vpow2.f32 %v1646_v48 }
 0xed6   :  { %v1839_v47 = vpop.f32.mrf.mxu0 }
 0xee2   :  { %v1990_v51 = vpop.eup %1989 }
 0xee3   :  { %v968_v52 = vadd.f32 1.0, %v1990_v51 }
 0xf2e   :  { %v1056_v49 = vpop.permute.xlu1 %1055 }
 0xf2f   :  { %v1058_v50 = vadd.f32 %v1056_v49, %v2435_v42 }
 0xf31   :  { %1991 = vtanh.f32 %v1058_v50 }
 0xf32   :  { %1993 = vrcp.f32 %v968_v52 }
 0xf3e   :  { %v1992_v56 = vpop.eup %1991 }
 0xf3f   :  { %1062 = vrot.lane.b32.xlu0 %v1992_v56, %s2128_s2  ;;  %v1994_v55 = vpop.eup %1993 }
 0xf40   :  { %v982_v20 = vsub.f32 1.0, %v1994_v55  ;;  %v988_v18 = vmul.f32 %v1994_v55, %v2465_v24 }
 0xf45   :  { %v973_v8 = vpop.permute.xlu1 %972 }
 0xf46   :  { %v975_v15 = vmul.f32 %v1994_v55, %v973_v8 }
 0xf48   :  { %977 = vrot.lane.b32.xlu1 %v975_v15, %s2124_s14 }
 0xfb1   :  { %v1063_v61 = vpop.permute.xlu0 %1062 }
 0xfb2   :  { %v1065_v63 = vmul.f32 %v1063_v61, %v1060_v59 }
 0xfb4   :  { %v2486_v2 = vadd.f32 %v1068_v62, %v1065_v63 }
 0xfb6   :  { %1071 = vrot.lane.b32.xlu1 %v2486_v2, %s2128_s2  ;;  %v1149_v4 = vpack.c.bf16 %v2486_v2, %v2486_v2  ;;  %v1226_v8 = vrot.slane %v2486_v2, 6 }
 0xfb8   :  { %v1151_v6 = vrot.slane %v1149_v4, 1 }
 0xfba   :  { %1152 = vrot.lane.b32.xlu0 %v1151_v6, %s2128_s2  ;;  %v978_v7 = vpop.permute.xlu1 %977 }
 0xfbb   :  { %v980_v12 = vadd.f32 %v978_v7, %v960_v44 }
 0xfbd   :  { %1995 = vtanh.f32 %v980_v12 }
 0xfca   :  { %v1996_v13 = vpop.eup %1995 }
 0xfcb   :  { %984 = vrot.lane.b32.xlu0 %v1996_v13, %s2128_s2 }
0x1028   :  { %v1072_v21 = vpop.permute.xlu1 %1071 }
0x102c   :  { %v1153_v10 = vpop.permute.xlu0 %1152 }
0x102d   :  { %1865 = vmatmul.mubr.msk.bf16.vlgmr.msra.gmra.mxu0 %vm173_vm2, %v1153_v10 }
0x102e   :  { %1869 = vmatpush3.bf16.msra.mxu0 %v2263_v53  ;;  %1876 = vmatprep.mubr.msk.bf16.mxu0 %vm2127_vm0, %v2126_v0 }
0x102f   :  { %1870 = vmatprep.subr.bf16.mxu0 %v2126_v0 }
0x1032   :  { %1871 = vmatpush3.bf16.msra.mxu0 %v2269_v54 }
0x1033   :  { %1872 = vmatprep.subr.bf16.mxu0 %v2126_v0 }
0x1036   :  { %1873 = vmatpush3.bf16.msra.mxu0 %v2282_v57 }
0x1037   :  { %1874 = vmatprep.subr.bf16.mxu0 %v2126_v0 }
0x103a   :  { %1875 = vmatpush3.bf16.msra.mxu0 %v2291_v58 }
0x103b   :  { %1900 = vmatprep.subr.mxu0 %v2126_v0 }
0x103d   :  { %v985_v17 = vpop.permute.xlu0 %984 }
0x103e   :  { %v987_v14 = vmul.f32 %v985_v17, %v982_v20 }
0x1040   :  { %v2506_v19 = vadd.f32 %v988_v18, %v987_v14 }
0x1042   :  { %v1075_v5 = vrot.slane %v2506_v19, 6 }
0x1044   :  { %v1077_v22 = vsel %vm173_vm2, %v1072_v21, %v1075_v5 }
0x1045   :  { %v1078_v23 = vpack.c.bf16 %v1077_v22, %v1077_v22 }
0x1047   :  { %v1080_v9 = vrot.slane %v1078_v23, 1 }
0x1049   :  { %1857 = vmatmul.mubr.msk.bf16.vlgmr.msra.gmra.mxu1 %vm291_vm3, %v1080_v9 }
0x104a   :  { %1881 = vmatpush3.bf16.msra.mxu1 %v2209_v1  ;;  %1884 = vmatprep.mubr.msk.bf16.mxu1 %vm2127_vm0, %v2126_v0 }
0x104b   :  { %1882 = vmatprep.subr.bf16.mxu1 %v2126_v0 }
0x104e   :  { %1883 = vmatpush3.bf16.msra.mxu1 %v2215_v3 }
0x104f   :  { %1888 = vmatprep.subr.bf16.mxu1 %v2126_v0 }
0x10ed   :  { %v1191_v24 = vpop.f32.mrf.mxu0 }
0x10ee   :  { %v1207_v25 = vadd.f32 %v1191_v24, %v2237_v11  ;;  %v1198_v3 = vrot.slane %v1191_v24, 4 }
0x10ef   :  { %v1866_v26 = vpop.f32.mrf.mxu0 }
0x10f0   :  { %v1209_v27 = vrot.slane %v1207_v25, 4  ;;  %v1200_v34 = vadd.f32 %v1198_v3, %v2435_v42 }
0x10f1   :  { %v1194_v28 = vpop.f32.mrf.mxu0 }
0x10f2   :  { %1210 = vrot.lane.b32.xlu0 %v1209_v27, %s2124_s14  ;;  %v1652_v35 = vmul.f32 -1.442695, %v1200_v34 }
0x10f3   :  { %v1867_v29 = vpop.f32.mrf.mxu0 }
0x10f4   :  { %1997 = vpow2.f32 %v1652_v35 }
0x1101   :  { %v1998_v36 = vpop.eup %1997 }
0x1102   :  { %v1204_v37 = vadd.f32 1.0, %v1998_v36 }
0x1104   :  { %1999 = vrcp.f32 %v1204_v37 }
0x1109   :  { %v1118_v30 = vpop.f32.mrf.mxu1 }
0x110a   :  { %v1119_v1 = vadd.f32 %v2329_v16, %v1118_v30 }
0x110b   :  { %v1858_v31 = vpop.f32.mrf.mxu1 }
0x110c   :  { %1131 = vrot.lane.b32.xlu0 %v1119_v1, %s2118_s20  ;;  %v1650_v38 = vmul.f32 -1.442695, %v1119_v1 }
0x110d   :  { %v1121_v32 = vpop.f32.mrf.mxu1 }
0x110e   :  { %2001 = vpow2.f32 %v1650_v38 }
0x110f   :  { %v1859_v33 = vpop.f32.mrf.mxu1 }
0x1111   :  { %v2000_v39 = vpop.eup %1999 }
0x1112   :  { %v1220_v55 = vsub.f32 1.0, %v2000_v39  ;;  %v1228_v59 = vmul.f32 %v2000_v39, %v1226_v8 }
0x111b   :  { %v2002_v43 = vpop.eup %2001 }
0x111c   :  { %v1127_v44 = vadd.f32 1.0, %v2002_v43 }
0x111e   :  { %2003 = vrcp.f32 %v1127_v44 }
0x112b   :  { %v2004_v45 = vpop.eup %2003 }
0x112c   :  { %v1141_v6 = vsub.f32 1.0, %v2004_v45  ;;  %v1147_v12 = vmul.f32 %v2004_v45, %v2506_v19 }
0x1164   :  { %v1211_v40 = vpop.permute.xlu0 %1210 }
0x1165   :  { %v1213_v41 = vmul.f32 %v2000_v39, %v1211_v40 }
0x1167   :  { %1215 = vrot.lane.b32.xlu1 %v1213_v41, %s2124_s14 }
0x117e   :  { %v1132_v46 = vpop.permute.xlu0 %1131 }
0x117f   :  { %v1134_v47 = vmul.f32 %v2004_v45, %v1132_v46 }
0x1181   :  { %1136 = vrot.lane.b32.xlu0 %v1134_v47, %s2124_s14 }
0x11d9   :  { %v1216_v48 = vpop.permute.xlu1 %1215 }
0x11da   :  { %v1218_v49 = vadd.f32 %v1216_v48, %v2435_v42 }
0x11dc   :  { %2005 = vtanh.f32 %v1218_v49 }
0x11e9   :  { %v2006_v50 = vpop.eup %2005 }
0x11ea   :  { %1222 = vrot.lane.b32.xlu1 %v2006_v50, %s2128_s2 }
0x11f3   :  { %v1137_v51 = vpop.permute.xlu0 %1136 }
0x11f4   :  { %v1139_v52 = vadd.f32 %v1137_v51, %v1119_v1 }
0x11f6   :  { %2007 = vtanh.f32 %v1139_v52 }
0x1203   :  { %v2008_v56 = vpop.eup %2007 }
0x1204   :  { %1143 = vrot.lane.b32.xlu0 %v2008_v56, %s2128_s2 }
0x125c   :  { %v1223_v15 = vpop.permute.xlu1 %1222 }
0x125d   :  { %v1225_v60 = vmul.f32 %v1223_v15, %v1220_v55 }
0x125f   :  { %v2528_v61 = vadd.f32 %v1228_v59, %v1225_v60 }
0x1261   :  { %v1309_v62 = vpack.c.bf16 %v2528_v61, %v2528_v61  ;;  %v1386_v44 = vrot.slane %v2528_v61, 6 }
0x1263   :  { %v1311_v63 = vrot.slane %v1309_v62, 2 }
0x1265   :  { %1312 = vrot.lane.b32.xlu1 %v1311_v63, %s2128_s2 }
0x1269   :  { %1231 = vrot.lane.b32.xlu1 %v2528_v61, %s2128_s2 }
0x1276   :  { %v1144_v4 = vpop.permute.xlu0 %1143 }
0x1277   :  { %v1146_v7 = vmul.f32 %v1144_v4, %v1141_v6 }
0x1279   :  { %v2536_v2 = vadd.f32 %v1147_v12, %v1146_v7 }
0x127b   :  { %v1235_v10 = vrot.slane %v2536_v2, 4 }
0x12d7   :  { %v1313_v13 = vpop.permute.xlu1 %1312 }
0x12d8   :  { %1885 = vmatmul.mubr.msk.bf16.vlgmr.msra.gmra.mxu1 %vm173_vm2, %v1313_v13 }
0x12d9   :  { %1889 = vmatpush3.bf16.msra.mxu1 %v2263_v53  ;;  %1896 = vmatprep.mubr.msk.bf16.mxu1 %vm2127_vm0, %v2126_v0 }
0x12da   :  { %1890 = vmatprep.subr.bf16.mxu1 %v2126_v0 }
0x12db   :  { %v1232_v20 = vpop.permute.xlu1 %1231 }
0x12dc   :  { %v1237_v17 = vsel %vm173_vm2, %v1232_v20, %v1235_v10 }
0x12dd   :  { %v1238_v18 = vpack.c.bf16 %v1237_v17, %v1237_v17  ;;  %1891 = vmatpush3.bf16.msra.mxu1 %v2269_v54 }
0x12de   :  { %1892 = vmatprep.subr.bf16.mxu1 %v2126_v0 }
0x12df   :  { %v1240_v14 = vrot.slane %v1238_v18, 2 }
0x12e1   :  { %1877 = vmatmul.mubr.msk.bf16.vlgmr.msra.gmra.mxu0 %vm291_vm3, %v1240_v14  ;;  %1893 = vmatpush3.bf16.msra.mxu1 %v2282_v57 }
0x12e2   :  { %1894 = vmatprep.subr.bf16.mxu1 %v2126_v0  ;;  %1908 = vmatprep.mubr.msk.f32.mxu0 %vm2127_vm0, %v2126_v0 }
0x12e5   :  { %1895 = vmatpush3.bf16.msra.mxu1 %v2291_v58 }
0x1398   :  { %v1351_v53 = vpop.f32.mrf.mxu1 }
0x1399   :  { %v1367_v19 = vadd.f32 %v1351_v53, %v2237_v11  ;;  %v1358_v26 = vrot.slane %v1351_v53, 2 }
0x139a   :  { %v1886_v5 = vpop.f32.mrf.mxu1 }
0x139b   :  { %v1369_v21 = vrot.slane %v1367_v19, 2  ;;  %v1360_v58 = vadd.f32 %v1358_v26, %v2435_v42 }
0x139c   :  { %v1354_v54 = vpop.f32.mrf.mxu1 }
0x139d   :  { %1370 = vrot.lane.b32.xlu0 %v1369_v21, %s2124_s14  ;;  %v1656_v27 = vmul.f32 -1.442695, %v1360_v58  ;;  %v1660_v58 = vld [vmem:[%s2613_s8] ss:$0 sm:$0xff] }
0x139e   :  { %v1887_v22 = vpop.f32.mrf.mxu1 }
0x139f   :  { %2009 = vpow2.f32 %v1656_v27  ;;  %v1659_v22 = vld [vmem:[%s2612_s7] ss:$0 sm:$0xff]  ;;  %v1516_v27 = vld [vmem:[%s2614_s9 + $0x18] sm:$0xff] }
0x13a0   :  { %1901 = vmatpush3.msra.mxu0 %v1516_v27 }
0x13a1   :  { %v1278_v23 = vpop.f32.mrf.mxu0  ;;  %1902 = vmatprep.subr.mxu0 %v2126_v0 }
0x13a2   :  { %v1279_v9 = vadd.f32 %v2329_v16, %v1278_v23 }
0x13a3   :  { %v1878_v57 = vpop.f32.mrf.mxu0 }
0x13a4   :  { %1291 = vrot.lane.b32.xlu1 %v1279_v9, %s2118_s20  ;;  %v1654_v11 = vmul.f32 -1.442695, %v1279_v9 }
0x13a5   :  { %v1281_v24 = vpop.f32.mrf.mxu0 }
0x13a6   :  { %2011 = vpow2.f32 %v1654_v11  ;;  %v1515_v11 = vld [vmem:[%s2614_s9 + $0x10] sm:$0xff] }
0x13a7   :  { %v1879_v25 = vpop.f32.mrf.mxu0  ;;  %1903 = vmatpush3.msra.mxu0 %v1515_v11 }
0x13a8   :  { %1904 = vmatprep.subr.mxu0 %v2126_v0 }
0x13ac   :  { %v2010_v28 = vpop.eup %2009 }
0x13ad   :  { %v1364_v29 = vadd.f32 1.0, %v2010_v28  ;;  %v1514_v28 = vld [vmem:[%s2614_s9 + $0x8] sm:$0xff] }
0x13ae   :  { %1905 = vmatpush3.msra.mxu0 %v1514_v28 }
0x13af   :  { %2013 = vrcp.f32 %v1364_v29  ;;  %v1513_v29 = vld [vmem:[%s2614_s9] sm:$0xff]  ;;  %1906 = vmatprep.subr.mxu0 %v2126_v0 }
0x13b0   :  { %1907 = vmatpush3.msra.mxu0 %v1513_v29  ;;  %v1661_v0 = vld [vmem:[%s2615_s10] ss:$0 sm:$0xff] }
0x13b3   :  { %v2012_v30 = vpop.eup %2011 }
0x13b4   :  { %v1287_v1 = vadd.f32 1.0, %v2012_v30 }
0x13b6   :  { %2015 = vrcp.f32 %v1287_v1 }
0x13bc   :  { %v2014_v31 = vpop.eup %2013 }
0x13bd   :  { %v1380_v43 = vsub.f32 1.0, %v2014_v31  ;;  %v1388_v46 = vmul.f32 %v2014_v31, %v1386_v44 }
0x13c3   :  { %v2016_v3 = vpop.eup %2015 }
0x13c4   :  { %v1301_v49 = vsub.f32 1.0, %v2016_v3  ;;  %v1307_v51 = vmul.f32 %v2016_v3, %v2536_v2 }
0x140f   :  { %v1371_v32 = vpop.permute.xlu0 %1370 }
0x1410   :  { %v1373_v33 = vmul.f32 %v2014_v31, %v1371_v32 }
0x1412   :  { %1375 = vrot.lane.b32.xlu0 %v1373_v33, %s2124_s14 }
0x1416   :  { %v1292_v34 = vpop.permute.xlu1 %1291 }
0x1417   :  { %v1294_v35 = vmul.f32 %v2016_v3, %v1292_v34 }
0x1419   :  { %1296 = vrot.lane.b32.xlu1 %v1294_v35, %s2124_s14 }
0x1484   :  { %v1376_v36 = vpop.permute.xlu0 %1375 }
0x1485   :  { %v1378_v37 = vadd.f32 %v1376_v36, %v2435_v42 }
0x1487   :  { %2017 = vtanh.f32 %v1378_v37 }
0x148b   :  { %v1297_v38 = vpop.permute.xlu1 %1296 }
0x148c   :  { %v1299_v39 = vadd.f32 %v1297_v38, %v1279_v9 }
0x148e   :  { %2019 = vtanh.f32 %v1299_v39 }
0x1494   :  { %v2018_v40 = vpop.eup %2017 }
0x1495   :  { %1382 = vrot.lane.b32.xlu0 %v2018_v40, %s2128_s2 }
0x149b   :  { %v2020_v41 = vpop.eup %2019 }
0x149c   :  { %1303 = vrot.lane.b32.xlu1 %v2020_v41, %s2128_s2 }
0x1507   :  { %v1383_v45 = vpop.permute.xlu0 %1382 }
0x1508   :  { %v1385_v47 = vmul.f32 %v1383_v45, %v1380_v43 }
0x150a   :  { %v1389_v48 = vadd.f32 %v1388_v46, %v1385_v47 }
0x150c   :  { %1391 = vrot.lane.b32.xlu0 %v1389_v48, %s2128_s2 }
0x150e   :  { %v1304_v42 = vpop.permute.xlu1 %1303 }
0x150f   :  { %v1306_v50 = vmul.f32 %v1304_v42, %v1301_v49 }
0x1511   :  { %v1308_v52 = vadd.f32 %v1307_v51, %v1306_v50 }
0x1513   :  { %v1395_v56 = vrot.slane %v1308_v52, 2 }
0x157e   :  { %v1392_v55 = vpop.permute.xlu0 %1391 }
0x157f   :  { %v1397_v8 = vsel %vm173_vm2, %v1392_v55, %v1395_v56 }
0x1580   :  { %v1398_v15 = vpack.c.bf16 %v1397_v8, %v1397_v8 }
0x1582   :  { %v1400_v59 = vrot.slane %v1398_v15, 3 }
0x1584   :  { %1897 = vmatmul.mubr.msk.bf16.vlgmr.msra.gmra.mxu1 %vm291_vm3, %v1400_v59 }
0x1644   :  { %v1438_v60 = vpop.f32.mrf.mxu1 }
0x1645   :  { %v1439_v61 = vadd.f32 %v2329_v16, %v1438_v60 }
0x1646   :  { %v1898_v62 = vpop.f32.mrf.mxu1 }
0x1647   :  { %1451 = vrot.lane.b32.xlu1 %v1439_v61, %s2118_s20  ;;  %v1658_v6 = vmul.f32 -1.442695, %v1439_v61 }
0x1648   :  { %v1441_v63 = vpop.f32.mrf.mxu1 }
0x1649   :  { %2021 = vpow2.f32 %v1658_v6 }
0x164a   :  { %v1899_v4 = vpop.f32.mrf.mxu1 }
0x1656   :  { %v2022_v7 = vpop.eup %2021 }
0x1657   :  { %v1447_v12 = vadd.f32 1.0, %v2022_v7 }
0x1659   :  { %2023 = vrcp.f32 %v1447_v12 }
0x1666   :  { %v2024_v2 = vpop.eup %2023 }
0x1667   :  { %v1461_v16 = vsub.f32 1.0, %v2024_v2  ;;  %v1467_v53 = vmul.f32 %v2024_v2, %v1308_v52 }
0x16b9   :  { %v1452_v13 = vpop.permute.xlu1 %1451 }
0x16ba   :  { %v1454_v10 = vmul.f32 %v2024_v2, %v1452_v13 }
0x16bc   :  { %1456 = vrot.lane.b32.xlu0 %v1454_v10, %s2124_s14 }
0x172e   :  { %v1457_v20 = vpop.permute.xlu0 %1456 }
0x172f   :  { %v1459_v17 = vadd.f32 %v1457_v20, %v1439_v61 }
0x1731   :  { %2025 = vtanh.f32 %v1459_v17 }
0x173e   :  { %v2026_v18 = vpop.eup %2025 }
0x173f   :  { %1463 = vrot.lane.b32.xlu1 %v2026_v18, %s2128_s2 }
0x17b1   :  { %v1464_v14 = vpop.permute.xlu1 %1463 }
0x17b2   :  { %v1466_v19 = vmul.f32 %v1464_v14, %v1461_v16 }
0x17b4   :  { %v1468_v5 = vadd.f32 %v1467_v53, %v1466_v19 }
0x17b6   :  { %1470 = vrot.lane.b32.xlu0 %v1468_v5, %s2128_s2 }
0x1828   :  { %v1471_v21 = vpop.permute.xlu0 %1470 }
0x1829   :  { %v1474_v54 = vsel %vm1473_vm4, %v1471_v21, 0.0 }
0x182a   :  { %1475 = vadd.xlane.f32.xlu1 %v1474_v54 }
0x183b   :  { %1498 = vrot.lane.b32.xlu1 %v1659_v22, %s2118_s20 }
0x18b3   :  { %v1476_v23 = vpop.xlane.xlu1 %1475 }
0x18b4   :  { %v1478_v9 = vmul.f32 0.03125, %v1476_v23 }
0x18b6   :  { %v1479_v57 = vsub.f32 %v1468_v5, %v1478_v9 }
0x18b7   :  { %v1499_v33 = vpop.permute.xlu1 %1498 }
0x18b8   :  { %v1480_v24 = vmul.f32 %v1479_v57, %v1479_v57 }
0x18ba   :  { %1482 = vrot.lane.b32.xlu0 %v1480_v24, %s2128_s2 }
0x192c   :  { %v1483_v25 = vpop.permute.xlu0 %1482 }
0x192d   :  { %v1485_v26 = vsel %vm1473_vm4, %v1483_v25, 0.0 }
0x192e   :  { %1486 = vadd.xlane.f32.xlu0 %v1485_v26 }
0x1944   :  { %1508 = vrot.lane.b32.xlu0 %v1660_v58, %s2118_s20 }
0x19b7   :  { %v1487_v30 = vpop.xlane.xlu0 %1486 }
0x19b8   :  { %v1488_v1 = vmul.f32 0.03125, %v1487_v30 }
0x19ba   :  { %v1489_v31 = vadd.f32 1e-05, %v1488_v1 }
0x19bb   :  { %v1509_v34 = vpop.permute.xlu0 %1508 }
0x19bc   :  { %2027 = vrsqrt.f32 %v1489_v31 }
0x19c9   :  { %v2028_v32 = vpop.eup %2027 }
0x19ca   :  { %v1491_v3 = vmul.f32 %v2028_v32, %v1479_v57 }
0x19cc   :  { %v1501_v35 = vmul.f32 %v1499_v33, %v1491_v3 }
0x19ce   :  { %v1511_v36 = vadd.f32 %v1509_v34, %v1501_v35 }
0x19d0   :  { %2029 = vtanh.f32 %v1511_v36 }
0x19dd   :  { %v2030_v37 = vpop.eup %2029 }
0x19de   :  { %1525 = vrot.lane.b32.xlu1 %v2030_v37, %s2128_s2 }
0x1a50   :  { %v1526_v38 = vpop.permute.xlu1 %1525 }
0x1a51   :  { %1909 = vmatmul.mubr.msk.f32.vlgmr.msra.gmra.mxu0 %vm173_vm2, %v1526_v38 }
0x1b11   :  { %v1595_v39 = vpop.f32.mrf.mxu0 }
0x1b12   :  { %v1596_v40 = vadd.f32 %v1661_v0, %v1595_v39 }
0x1b13   :  { %v1910_v41 = vpop.f32.mrf.mxu0 }
0x1b14   :  { %1600 = vst.msk [vmem:[#allocation8] sm:$0x3] %vm1599_vm5, %v1596_v40 }
0x1b15   :  { %2102 = shalt.err (!%p2099_p5)
}
0x1b16   :  { %1610 = dma.vmem_to_hbm [thread:$0]  %s1608_s3, 32, %s2616_s11, [#allocation4]  }
0x1b17   :  { %2115 = dma.done.wait [#allocation4], 32  }
0x1b18   :  { %2116 = vsyncadd [#allocation4], 4294967264 }
0x1b19   :  { %1614 = vsyncpa [#allocation3], 1 }
0x1b1a   :  { %1615 = vsyncpa [#allocation6], 1 }
0x1b1b   :  { %1616 = vsyncpa [#allocation4], 1 }

</bundles_post_ra>
